<compile_context>
chip_gen: v7x
topology: tpu7x:2x2x1
jax: 0.10.0
libtpu: 0.0.40
codegen_flags: <defaults>
</compile_context>

<pallas_src>
import numpy as np
import jax
import jax.numpy as jnp
from jax.experimental import pallas as pl
from jax.experimental.pallas import tpu as pltpu


# ----------------------------------------------------------------------------
# Architecture helpers (mirrors generate_hidden_dims with strategy='linear')
# ----------------------------------------------------------------------------
def generate_hidden_dims(hidden_dim, latent_dim, depth):
    """Linearly decreasing widths from hidden_dim to latent_dim, `depth` pairs."""
    dims = np.linspace(hidden_dim, latent_dim, depth + 1).round().astype(int)
    return [(int(a), int(b)) for a, b in zip(dims[:-1], dims[1:])]


def round_up(n, m):
    return ((n + m - 1) // m) * m


# ----------------------------------------------------------------------------
# Pallas kernel: full encoder MLP for one batch tile
# ----------------------------------------------------------------------------
def make_encoder_kernel(num_body_layers):
    def kernel(x_ref, *refs):
        n_params = 2 * num_body_layers + 2          # per body layer (W, b); + fused head (W, b)
        param_refs = refs[:n_params]
        out_ref = refs[n_params]

        h = x_ref[...]                               # bf16 [TILE_B, in_width]
        idx = 0
        for _ in range(num_body_layers):
            w, b = param_refs[idx], param_refs[idx + 1]
            idx += 2
            # Linear (+ folded eval-mode BatchNorm) on the MXU, f32 accumulate.
            pre = jnp.dot(h, w[...], preferred_element_type=jnp.float32) + b[...]
            # LeakyReLU (slope 0.01) as max(x, 0.01x): one compare fewer than where().
            # Dropout is identity in eval mode.
            h = jnp.maximum(pre, 0.01 * pre).astype(jnp.bfloat16)

        # Fused mu|logvar head: single MXU pass, lane-dense store in out dtype (bf16).
        w, b = param_refs[idx], param_refs[idx + 1]
        head = jnp.dot(h, w[...], preferred_element_type=jnp.float32) + b[...]
        out_ref[...] = head.astype(out_ref.dtype)

    return kernel


# ----------------------------------------------------------------------------
# Tiling / VMEM heuristics
# ----------------------------------------------------------------------------
def choose_tile_b(B, max_tile=512, min_tile=128):
    """Largest batch tile <= max_tile that still leaves >= 2 grid steps (v7x has
    2 TensorCores; grid=(1,) would idle one of them), never below min_tile when
    the batch is large enough to matter."""
    Bp8 = round_up(max(B, 1), 8)
    tile = min(max_tile, Bp8)
    while tile > min_tile and (Bp8 + tile - 1) // tile < 2:
        tile //= 2
    tile = max(tile, min(min_tile, Bp8))
    return min(tile, Bp8)


def pick_vmem_limit(required_bytes):
    """Per-chip scoped-VMEM limit: generous on v5e/v6e (128 MiB physical), capped
    on v7x (64 MiB physical)."""
    try:
        cap = int(pltpu.get_tpu_info().vmem_capacity_bytes)
    except Exception:
        cap = 64 * 1024 * 1024          # conservative (v7x) if the query is unavailable
    lo = 32 * 1024 * 1024
    hi = (cap * 3) // 4                  # leave headroom for the compiler's own scratch
    want = max(lo, 2 * int(required_bytes))
    return int(max(min(want, hi), min(lo, hi)))


# ----------------------------------------------------------------------------
# Wrapper
# ----------------------------------------------------------------------------
def encoder_forward(x_in, body_wb, head_wb, *, tile_b=None, out_dtype=jnp.bfloat16):
    """x_in: [B, in_width] bf16 (in_width = true input_dim rounded to a multiple of 8).
    body_wb: list of (W bf16 [din, dout_pad], b f32 [1, dout_pad]) with eval-BN folded in.
    head_wb: (W bf16 [dh_pad, out_pad], b f32 [1, out_pad]) fused mu|logvar head.
    Returns the raw [B, out_pad] slab in out_dtype (mu/logvar sliced by the caller)."""
    B, in_w = x_in.shape
    out_pad = head_wb[0].shape[1]
    num_body = len(body_wb)

    if tile_b is None:
        tile_b = choose_tile_b(B)
    else:
        tile_b = min(tile_b, round_up(B, 8))
    Bp = round_up(B, tile_b)
    x = jnp.pad(x_in, ((0, Bp - B), (0, 0))) if Bp != B else x_in
    grid = (Bp // tile_b,)

    param_arrays = []
    for w, b in body_wb:
        param_arrays += [w, b]
    param_arrays += list(head_wb)

    # VMEM budget: single-buffered resident params + double-buffered x/out tiles
    # + slack for f32 activation intermediates.
    resident_bytes = sum(a.size * a.dtype.itemsize for a in param_arrays)
    io_bytes = (2 * tile_b * in_w * x.dtype.itemsize
                + 2 * tile_b * out_pad * jnp.dtype(out_dtype).itemsize)
    max_width = max(a.shape[-1] for a in param_arrays)
    scratch_bytes = 4 * tile_b * max_width * 4
    vmem_limit = pick_vmem_limit(resident_bytes + io_bytes + scratch_bytes)

    def _call(single_buffer_weights):
        def resident_spec(arr):
            # Constant block index: DMA'd once, resident across grid steps.
            if single_buffer_weights:
                return pl.BlockSpec(arr.shape, lambda i: (0, 0),
                                    pipeline_mode=pl.Buffered(1))
            return pl.BlockSpec(arr.shape, lambda i: (0, 0))

        in_specs = [pl.BlockSpec((tile_b, in_w), lambda i: (i, 0))]
        in_specs += [resident_spec(a) for a in param_arrays]
        out_specs = pl.BlockSpec((tile_b, out_pad), lambda i: (i, 0))

        return pl.pallas_call(
            make_encoder_kernel(num_body),
            out_shape=jax.ShapeDtypeStruct((Bp, out_pad), out_dtype),
            grid=grid,
            in_specs=in_specs,
            out_specs=out_specs,
            compiler_params=pltpu.CompilerParams(
                dimension_semantics=("parallel",),   # batch tiles independent (v7x: 2 TCs)
                vmem_limit_bytes=vmem_limit,
            ),
        )(x, *param_arrays)

    try:
        out = _call(True)
    except Exception:
        # Portability guard: fall back to default double-buffering if this jax
        # build does not accept pipeline_mode=pl.Buffered(1) on TPU BlockSpecs.
        out = _call(False)
    return out[:B]


# ----------------------------------------------------------------------------
# Deterministic parameter construction (PyTorch-style uniform init)
# ----------------------------------------------------------------------------
def init_linear(key, fan_in, fan_out):
    kw, kb = jax.random.split(key)
    bound = 1.0 / np.sqrt(fan_in)
    w = jax.random.uniform(kw, (fan_in, fan_out), jnp.float32, -bound, bound)
    b = jax.random.uniform(kb, (1, fan_out), jnp.float32, -bound, bound)
    return w, b


def build_params(key, input_dim, hidden_dim, latent_dim, depth):
    """Raw (unfolded, unpadded) PyTorch-equivalent parameters."""
    layer_dims = [(input_dim, hidden_dim)] + generate_hidden_dims(hidden_dim, latent_dim, depth)
    keys = jax.random.split(key, len(layer_dims) + 2)
    body = [init_linear(keys[i], din, dout) for i, (din, dout) in enumerate(layer_dims)]
    hidden_out = layer_dims[-1][1]
    wmu, bmu = init_linear(keys[-2], hidden_out, latent_dim)
    wlv, blv = init_linear(keys[-1], hidden_out, latent_dim)
    return body, (wmu, bmu, wlv, blv)


def identity_bn_stats(body):
    """Fresh-module eval-mode BN statistics: gamma=1, beta=0, mean=0, var=1."""
    stats = []
    for (w, _) in body:
        d = w.shape[1]
        stats.append((jnp.ones((d,), jnp.float32), jnp.zeros((d,), jnp.float32),
                      jnp.zeros((d,), jnp.float32), jnp.ones((d,), jnp.float32)))
    return stats


def prepare_kernel_params(body, head, input_dim, bn_stats=None, eps=1e-5):
    """Fold eval-mode BN (general gamma/beta/mean/var) into W/b, pad output feature
    dims to 128 lanes, keep the input feature dim narrow (multiple of 8), cast
    weights to bf16, and fuse the mu/logvar heads into one weight/bias."""
    if bn_stats is None:
        bn_stats = identity_bn_stats(body)

    def pad_wb(w, b, din_pad, dout_pad):
        din, dout = w.shape
        wp = jnp.zeros((din_pad, dout_pad), jnp.float32).at[:din, :dout].set(w)
        bp = jnp.zeros((1, dout_pad), jnp.float32).at[:, :dout].set(b)
        return wp.astype(jnp.bfloat16), bp

    in_width = round_up(input_dim, 8)        # true input width (no 128-pad in HBM)
    body_k = []
    for (w, b), (gamma, beta, mean, var) in zip(body, bn_stats):
        scale = gamma / jnp.sqrt(var + eps)
        w_f = w * scale[None, :]
        b_f = (b - mean[None, :]) * scale[None, :] + beta[None, :]
        dout_pad = round_up(w.shape[1], 128)
        body_k.append(pad_wb(w_f, b_f, in_width, dout_pad))
        in_width = dout_pad

    wmu, bmu, wlv, blv = head
    w_head = jnp.concatenate([wmu, wlv], axis=1)   # [hidden, 2*latent]  (mu | logvar)
    b_head = jnp.concatenate([bmu, blv], axis=1)
    head_k = pad_wb(w_head, b_head, in_width, round_up(w_head.shape[1], 128))
    return body_k, head_k


def pad_input(x, input_dim):
    B, D = x.shape
    in_width = round_up(input_dim, 8)
    if in_width != D:
        x = jnp.zeros((B, in_width), x.dtype).at[:, :D].set(x)
    return x.astype(jnp.bfloat16)


# ----------------------------------------------------------------------------
# Pure-JAX references for verification
# ----------------------------------------------------------------------------
def encoder_reference_f32(x, body, head, bn_stats=None, eps=1e-5):
    """Exact eval-mode semantics of the PyTorch module in f32."""
    if bn_stats is None:
        bn_stats = identity_bn_stats(body)
    h = x.astype(jnp.float32)
    for (w, b), (gamma, beta, mean, var) in zip(body, bn_stats):
        h = h @ w + b
        h = (h - mean[None, :]) / jnp.sqrt(var[None, :] + eps) * gamma[None, :] + beta[None, :]
        h = jnp.where(h > 0, h, 0.01 * h)
    wmu, bmu, wlv, blv = head
    return h @ wmu + bmu, h @ wlv + blv


def encoder_reference_kernel_path(xp, body_k, head_k, latent_dim, out_dtype=jnp.bfloat16):
    """Same folded/padded/bf16 math as the kernel, in plain JAX."""
    h = xp
    for (w, b) in body_k:
        pre = jnp.dot(h, w, preferred_element_type=jnp.float32) + b
        h = jnp.maximum(pre, 0.01 * pre).astype(jnp.bfloat16)
    wh, bh = head_k
    out = (jnp.dot(h, wh, preferred_element_type=jnp.float32) + bh).astype(out_dtype)
    return out[:, :latent_dim], out[:, latent_dim:2 * latent_dim]


if __name__ == "__main__":
    # Small shapes consistent with the module's forward (features, not images).
    # B=512 -> tile_b=256 (fills v6e/v7x MXU M-dim) with grid=(2,) (both v7x TCs busy).
    B, INPUT_DIM, HIDDEN_DIM, LATENT_DIM, DEPTH = 512, 16, 32, 8, 2

    key = jax.random.PRNGKey(0)
    kx, kp = jax.random.split(key)
    x = jax.random.normal(kx, (B, INPUT_DIM), jnp.float32)

    body, head = build_params(kp, INPUT_DIM, HIDDEN_DIM, LATENT_DIM, DEPTH)
    body_k, head_k = prepare_kernel_params(body, head, INPUT_DIM)
    xp = pad_input(x, INPUT_DIM)

    out = encoder_forward(xp, body_k, head_k)
    jax.block_until_ready(out)

    mu = np.asarray(out[:, :LATENT_DIM].astype(jnp.float32))
    logvar = np.asarray(out[:, LATENT_DIM:2 * LATENT_DIM].astype(jnp.float32))

    # Check against the exact same folded/padded/bf16 math in plain JAX (tight).
    mu_k, lv_k = encoder_reference_kernel_path(xp, body_k, head_k, LATENT_DIM)
    np.testing.assert_allclose(mu, np.asarray(mu_k.astype(jnp.float32)), rtol=1e-2, atol=1e-2)
    np.testing.assert_allclose(logvar, np.asarray(lv_k.astype(jnp.float32)), rtol=1e-2, atol=1e-2)

    # Check against the original f32 eval-mode semantics (bf16 tolerance).
    mu_ref, lv_ref = encoder_reference_f32(x, body, head)
    np.testing.assert_allclose(mu, np.asarray(mu_ref), rtol=5e-2, atol=5e-2)
    np.testing.assert_allclose(logvar, np.asarray(lv_ref), rtol=5e-2, atol=5e-2)

    print("KERNEL_OK")
</pallas_src>

<mosaic_0001>
module attributes {stable_mosaic.version = 11 : i64} {
  func.func @kernel(%arg0: i32, %arg1: memref<256x16xbf16, #tpu.memory_space<vmem>>, %arg2: memref<16x128xbf16, #tpu.memory_space<vmem>>, %arg3: memref<1x128xf32, #tpu.memory_space<vmem>>, %arg4: memref<128x128xbf16, #tpu.memory_space<vmem>>, %arg5: memref<1x128xf32, #tpu.memory_space<vmem>>, %arg6: memref<128x128xbf16, #tpu.memory_space<vmem>>, %arg7: memref<1x128xf32, #tpu.memory_space<vmem>>, %arg8: memref<128x128xbf16, #tpu.memory_space<vmem>>, %arg9: memref<1x128xf32, #tpu.memory_space<vmem>>, %arg10: memref<256x128xbf16, #tpu.memory_space<vmem>>) attributes {dimension_semantics = [#tpu.dimension_semantics<parallel>], iteration_bounds = array<i64: 2>, scalar_prefetch = 0 : i64, scratch_operands = 0 : i64, tpu.core_type = #tpu.core_type<tc>, window_params = [{transform_indices = @transform_0, window_bounds = array<i64: 256, 16>}, {pipeline_mode = #tpu.pipeline_mode<synchronous>, transform_indices = @transform_1, window_bounds = array<i64: 16, 128>}, {pipeline_mode = #tpu.pipeline_mode<synchronous>, transform_indices = @transform_2, window_bounds = array<i64: 1, 128>}, {pipeline_mode = #tpu.pipeline_mode<synchronous>, transform_indices = @transform_3, window_bounds = array<i64: 128, 128>}, {pipeline_mode = #tpu.pipeline_mode<synchronous>, transform_indices = @transform_4, window_bounds = array<i64: 1, 128>}, {pipeline_mode = #tpu.pipeline_mode<synchronous>, transform_indices = @transform_5, window_bounds = array<i64: 128, 128>}, {pipeline_mode = #tpu.pipeline_mode<synchronous>, transform_indices = @transform_6, window_bounds = array<i64: 1, 128>}, {pipeline_mode = #tpu.pipeline_mode<synchronous>, transform_indices = @transform_7, window_bounds = array<i64: 128, 128>}, {pipeline_mode = #tpu.pipeline_mode<synchronous>, transform_indices = @transform_8, window_bounds = array<i64: 1, 128>}, {transform_indices = @transform_9, window_bounds = array<i64: 256, 128>}]} {
    %c0 = arith.constant 0 : index
    %c0_0 = arith.constant 0 : index
    %0 = vector.load %arg1[%c0, %c0_0] : memref<256x16xbf16, #tpu.memory_space<vmem>>, vector<256x16xbf16>
    %c0_1 = arith.constant 0 : index
    %c0_2 = arith.constant 0 : index
    %1 = vector.load %arg2[%c0_1, %c0_2] : memref<16x128xbf16, #tpu.memory_space<vmem>>, vector<16x128xbf16>
    %cst = arith.constant dense<0.000000e+00> : vector<256x128xf32>
    %2 = tpu.matmul %0, %1, %cst {dimension_numbers = #tpu.dot_dimension_numbers<[1], [0], [0], [1], [0, 0, 1, 1], [], []>} : vector<256x16xbf16>, vector<16x128xbf16>, vector<256x128xf32> -> vector<256x128xf32>
    %c0_3 = arith.constant 0 : index
    %c0_4 = arith.constant 0 : index
    %3 = vector.load %arg3[%c0_3, %c0_4] : memref<1x128xf32, #tpu.memory_space<vmem>>, vector<1x128xf32>
    %4 = vector.broadcast %3 : vector<1x128xf32> to vector<256x128xf32>
    %5 = arith.addf %2, %4 : vector<256x128xf32>
    %cst_5 = arith.constant 0.00999999977 : f32
    %6 = vector.broadcast %cst_5 : f32 to vector<256x128xf32>
    %7 = arith.mulf %6, %5 : vector<256x128xf32>
    %8 = arith.maximumf %5, %7 : vector<256x128xf32>
    %9 = arith.truncf %8 : vector<256x128xf32> to vector<256x128xbf16>
    %c0_6 = arith.constant 0 : index
    %c0_7 = arith.constant 0 : index
    %10 = vector.load %arg4[%c0_6, %c0_7] : memref<128x128xbf16, #tpu.memory_space<vmem>>, vector<128x128xbf16>
    %cst_8 = arith.constant dense<0.000000e+00> : vector<256x128xf32>
    %11 = tpu.matmul %9, %10, %cst_8 {dimension_numbers = #tpu.dot_dimension_numbers<[1], [0], [0], [1], [0, 0, 1, 1], [], []>} : vector<256x128xbf16>, vector<128x128xbf16>, vector<256x128xf32> -> vector<256x128xf32>
    %c0_9 = arith.constant 0 : index
    %c0_10 = arith.constant 0 : index
    %12 = vector.load %arg5[%c0_9, %c0_10] : memref<1x128xf32, #tpu.memory_space<vmem>>, vector<1x128xf32>
    %13 = vector.broadcast %12 : vector<1x128xf32> to vector<256x128xf32>
    %14 = arith.addf %11, %13 : vector<256x128xf32>
    %cst_11 = arith.constant 0.00999999977 : f32
    %15 = vector.broadcast %cst_11 : f32 to vector<256x128xf32>
    %16 = arith.mulf %15, %14 : vector<256x128xf32>
    %17 = arith.maximumf %14, %16 : vector<256x128xf32>
    %18 = arith.truncf %17 : vector<256x128xf32> to vector<256x128xbf16>
    %c0_12 = arith.constant 0 : index
    %c0_13 = arith.constant 0 : index
    %19 = vector.load %arg6[%c0_12, %c0_13] : memref<128x128xbf16, #tpu.memory_space<vmem>>, vector<128x128xbf16>
    %cst_14 = arith.constant dense<0.000000e+00> : vector<256x128xf32>
    %20 = tpu.matmul %18, %19, %cst_14 {dimension_numbers = #tpu.dot_dimension_numbers<[1], [0], [0], [1], [0, 0, 1, 1], [], []>} : vector<256x128xbf16>, vector<128x128xbf16>, vector<256x128xf32> -> vector<256x128xf32>
    %c0_15 = arith.constant 0 : index
    %c0_16 = arith.constant 0 : index
    %21 = vector.load %arg7[%c0_15, %c0_16] : memref<1x128xf32, #tpu.memory_space<vmem>>, vector<1x128xf32>
    %22 = vector.broadcast %21 : vector<1x128xf32> to vector<256x128xf32>
    %23 = arith.addf %20, %22 : vector<256x128xf32>
    %cst_17 = arith.constant 0.00999999977 : f32
    %24 = vector.broadcast %cst_17 : f32 to vector<256x128xf32>
    %25 = arith.mulf %24, %23 : vector<256x128xf32>
    %26 = arith.maximumf %23, %25 : vector<256x128xf32>
    %27 = arith.truncf %26 : vector<256x128xf32> to vector<256x128xbf16>
    %c0_18 = arith.constant 0 : index
    %c0_19 = arith.constant 0 : index
    %28 = vector.load %arg8[%c0_18, %c0_19] : memref<128x128xbf16, #tpu.memory_space<vmem>>, vector<128x128xbf16>
    %cst_20 = arith.constant dense<0.000000e+00> : vector<256x128xf32>
    %29 = tpu.matmul %27, %28, %cst_20 {dimension_numbers = #tpu.dot_dimension_numbers<[1], [0], [0], [1], [0, 0, 1, 1], [], []>} : vector<256x128xbf16>, vector<128x128xbf16>, vector<256x128xf32> -> vector<256x128xf32>
    %c0_21 = arith.constant 0 : index
    %c0_22 = arith.constant 0 : index
    %30 = vector.load %arg9[%c0_21, %c0_22] : memref<1x128xf32, #tpu.memory_space<vmem>>, vector<1x128xf32>
    %31 = vector.broadcast %30 : vector<1x128xf32> to vector<256x128xf32>
    %32 = arith.addf %29, %31 : vector<256x128xf32>
    %33 = arith.truncf %32 : vector<256x128xf32> to vector<256x128xbf16>
    %c0_23 = arith.constant 0 : index
    %c0_24 = arith.constant 0 : index
    %34 = vector.load %arg10[%c0_23, %c0_24] : memref<256x128xbf16, #tpu.memory_space<vmem>>, vector<256x128xbf16>
    tpu.vector_store %arg10[%c0_23, %c0_24], %33 {strides = array<i32>} : memref<256x128xbf16, #tpu.memory_space<vmem>>, vector<256x128xbf16>,
    return
  }
  func.func @transform_0(%arg0: i32) -> (i32, i32) {
    %c0_i32 = arith.constant 0 : i32
    %c0_i32_0 = arith.constant 0 : i32
    return %arg0, %c0_i32 : i32, i32
  }
  func.func @transform_1(%arg0: i32) -> (i32, i32) {
    %c0_i32 = arith.constant 0 : i32
    %c0_i32_0 = arith.constant 0 : i32
    %c0_i32_1 = arith.constant 0 : i32
    return %c0_i32, %c0_i32_0 : i32, i32
  }
  func.func @transform_2(%arg0: i32) -> (i32, i32) {
    %c0_i32 = arith.constant 0 : i32
    %c0_i32_0 = arith.constant 0 : i32
    %c0_i32_1 = arith.constant 0 : i32
    return %c0_i32, %c0_i32_0 : i32, i32
  }
  func.func @transform_3(%arg0: i32) -> (i32, i32) {
    %c0_i32 = arith.constant 0 : i32
    %c0_i32_0 = arith.constant 0 : i32
    %c0_i32_1 = arith.constant 0 : i32
    return %c0_i32, %c0_i32_0 : i32, i32
  }
  func.func @transform_4(%arg0: i32) -> (i32, i32) {
    %c0_i32 = arith.constant 0 : i32
    %c0_i32_0 = arith.constant 0 : i32
    %c0_i32_1 = arith.constant 0 : i32
    return %c0_i32, %c0_i32_0 : i32, i32
  }
  func.func @transform_5(%arg0: i32) -> (i32, i32) {
    %c0_i32 = arith.constant 0 : i32
    %c0_i32_0 = arith.constant 0 : i32
    %c0_i32_1 = arith.constant 0 : i32
    return %c0_i32, %c0_i32_0 : i32, i32
  }
  func.func @transform_6(%arg0: i32) -> (i32, i32) {
    %c0_i32 = arith.constant 0 : i32
    %c0_i32_0 = arith.constant 0 : i32
    %c0_i32_1 = arith.constant 0 : i32
    return %c0_i32, %c0_i32_0 : i32, i32
  }
  func.func @transform_7(%arg0: i32) -> (i32, i32) {
    %c0_i32 = arith.constant 0 : i32
    %c0_i32_0 = arith.constant 0 : i32
    %c0_i32_1 = arith.constant 0 : i32
    return %c0_i32, %c0_i32_0 : i32, i32
  }
  func.func @transform_8(%arg0: i32) -> (i32, i32) {
    %c0_i32 = arith.constant 0 : i32
    %c0_i32_0 = arith.constant 0 : i32
    %c0_i32_1 = arith.constant 0 : i32
    return %c0_i32, %c0_i32_0 : i32, i32
  }
  func.func @transform_9(%arg0: i32) -> (i32, i32) {
    %c0_i32 = arith.constant 0 : i32
    %c0_i32_0 = arith.constant 0 : i32
    return %arg0, %c0_i32 : i32, i32
  }
}

module attributes {stable_mosaic.version = 11 : i64} {
  func.func @kernel(%arg0: i32, %arg1: memref<256x16xbf16, #tpu.memory_space<vmem>>, %arg2: memref<16x128xbf16, #tpu.memory_space<vmem>>, %arg3: memref<1x128xf32, #tpu.memory_space<vmem>>, %arg4: memref<128x128xbf16, #tpu.memory_space<vmem>>, %arg5: memref<1x128xf32, #tpu.memory_space<vmem>>, %arg6: memref<128x128xbf16, #tpu.memory_space<vmem>>, %arg7: memref<1x128xf32, #tpu.memory_space<vmem>>, %arg8: memref<128x128xbf16, #tpu.memory_space<vmem>>, %arg9: memref<1x128xf32, #tpu.memory_space<vmem>>, %arg10: memref<256x128xbf16, #tpu.memory_space<vmem>>) attributes {dimension_semantics = [#tpu.dimension_semantics<parallel>], iteration_bounds = array<i64: 2>, scalar_prefetch = 0 : i64, scratch_operands = 0 : i64, tpu.core_type = #tpu.core_type<tc>, window_params = [{transform_indices = @transform_0, window_bounds = array<i64: 256, 16>}, {pipeline_mode = #tpu.pipeline_mode<synchronous>, transform_indices = @transform_1, window_bounds = array<i64: 16, 128>}, {pipeline_mode = #tpu.pipeline_mode<synchronous>, transform_indices = @transform_2, window_bounds = array<i64: 1, 128>}, {pipeline_mode = #tpu.pipeline_mode<synchronous>, transform_indices = @transform_3, window_bounds = array<i64: 128, 128>}, {pipeline_mode = #tpu.pipeline_mode<synchronous>, transform_indices = @transform_4, window_bounds = array<i64: 1, 128>}, {pipeline_mode = #tpu.pipeline_mode<synchronous>, transform_indices = @transform_5, window_bounds = array<i64: 128, 128>}, {pipeline_mode = #tpu.pipeline_mode<synchronous>, transform_indices = @transform_6, window_bounds = array<i64: 1, 128>}, {pipeline_mode = #tpu.pipeline_mode<synchronous>, transform_indices = @transform_7, window_bounds = array<i64: 128, 128>}, {pipeline_mode = #tpu.pipeline_mode<synchronous>, transform_indices = @transform_8, window_bounds = array<i64: 1, 128>}, {transform_indices = @transform_9, window_bounds = array<i64: 256, 128>}]} {
    %c0 = arith.constant 0 : index
    %c0_0 = arith.constant 0 : index
    %0 = vector.load %arg1[%c0, %c0_0] : memref<256x16xbf16, #tpu.memory_space<vmem>>, vector<256x16xbf16>
    %c0_1 = arith.constant 0 : index
    %c0_2 = arith.constant 0 : index
    %1 = vector.load %arg2[%c0_1, %c0_2] : memref<16x128xbf16, #tpu.memory_space<vmem>>, vector<16x128xbf16>
    %cst = arith.constant dense<0.000000e+00> : vector<256x128xf32>
    %2 = tpu.matmul %0, %1, %cst {dimension_numbers = #tpu.dot_dimension_numbers<[1], [0], [0], [1], [0, 0, 1, 1], [], []>} : vector<256x16xbf16>, vector<16x128xbf16>, vector<256x128xf32> -> vector<256x128xf32>
    %c0_3 = arith.constant 0 : index
    %c0_4 = arith.constant 0 : index
    %3 = vector.load %arg3[%c0_3, %c0_4] : memref<1x128xf32, #tpu.memory_space<vmem>>, vector<1x128xf32>
    %4 = vector.broadcast %3 : vector<1x128xf32> to vector<256x128xf32>
    %5 = arith.addf %2, %4 : vector<256x128xf32>
    %cst_5 = arith.constant 0.00999999977 : f32
    %6 = vector.broadcast %cst_5 : f32 to vector<256x128xf32>
    %7 = arith.mulf %6, %5 : vector<256x128xf32>
    %8 = arith.maximumf %5, %7 : vector<256x128xf32>
    %9 = arith.truncf %8 : vector<256x128xf32> to vector<256x128xbf16>
    %c0_6 = arith.constant 0 : index
    %c0_7 = arith.constant 0 : index
    %10 = vector.load %arg4[%c0_6, %c0_7] : memref<128x128xbf16, #tpu.memory_space<vmem>>, vector<128x128xbf16>
    %cst_8 = arith.constant dense<0.000000e+00> : vector<256x128xf32>
    %11 = tpu.matmul %9, %10, %cst_8 {dimension_numbers = #tpu.dot_dimension_numbers<[1], [0], [0], [1], [0, 0, 1, 1], [], []>} : vector<256x128xbf16>, vector<128x128xbf16>, vector<256x128xf32> -> vector<256x128xf32>
    %c0_9 = arith.constant 0 : index
    %c0_10 = arith.constant 0 : index
    %12 = vector.load %arg5[%c0_9, %c0_10] : memref<1x128xf32, #tpu.memory_space<vmem>>, vector<1x128xf32>
    %13 = vector.broadcast %12 : vector<1x128xf32> to vector<256x128xf32>
    %14 = arith.addf %11, %13 : vector<256x128xf32>
    %cst_11 = arith.constant 0.00999999977 : f32
    %15 = vector.broadcast %cst_11 : f32 to vector<256x128xf32>
    %16 = arith.mulf %15, %14 : vector<256x128xf32>
    %17 = arith.maximumf %14, %16 : vector<256x128xf32>
    %18 = arith.truncf %17 : vector<256x128xf32> to vector<256x128xbf16>
    %c0_12 = arith.constant 0 : index
    %c0_13 = arith.constant 0 : index
    %19 = vector.load %arg6[%c0_12, %c0_13] : memref<128x128xbf16, #tpu.memory_space<vmem>>, vector<128x128xbf16>
    %cst_14 = arith.constant dense<0.000000e+00> : vector<256x128xf32>
    %20 = tpu.matmul %18, %19, %cst_14 {dimension_numbers = #tpu.dot_dimension_numbers<[1], [0], [0], [1], [0, 0, 1, 1], [], []>} : vector<256x128xbf16>, vector<128x128xbf16>, vector<256x128xf32> -> vector<256x128xf32>
    %c0_15 = arith.constant 0 : index
    %c0_16 = arith.constant 0 : index
    %21 = vector.load %arg7[%c0_15, %c0_16] : memref<1x128xf32, #tpu.memory_space<vmem>>, vector<1x128xf32>
    %22 = vector.broadcast %21 : vector<1x128xf32> to vector<256x128xf32>
    %23 = arith.addf %20, %22 : vector<256x128xf32>
    %cst_17 = arith.constant 0.00999999977 : f32
    %24 = vector.broadcast %cst_17 : f32 to vector<256x128xf32>
    %25 = arith.mulf %24, %23 : vector<256x128xf32>
    %26 = arith.maximumf %23, %25 : vector<256x128xf32>
    %27 = arith.truncf %26 : vector<256x128xf32> to vector<256x128xbf16>
    %c0_18 = arith.constant 0 : index
    %c0_19 = arith.constant 0 : index
    %28 = vector.load %arg8[%c0_18, %c0_19] : memref<128x128xbf16, #tpu.memory_space<vmem>>, vector<128x128xbf16>
    %cst_20 = arith.constant dense<0.000000e+00> : vector<256x128xf32>
    %29 = tpu.matmul %27, %28, %cst_20 {dimension_numbers = #tpu.dot_dimension_numbers<[1], [0], [0], [1], [0, 0, 1, 1], [], []>} : vector<256x128xbf16>, vector<128x128xbf16>, vector<256x128xf32> -> vector<256x128xf32>
    %c0_21 = arith.constant 0 : index
    %c0_22 = arith.constant 0 : index
    %30 = vector.load %arg9[%c0_21, %c0_22] : memref<1x128xf32, #tpu.memory_space<vmem>>, vector<1x128xf32>
    %31 = vector.broadcast %30 : vector<1x128xf32> to vector<256x128xf32>
    %32 = arith.addf %29, %31 : vector<256x128xf32>
    %33 = arith.truncf %32 : vector<256x128xf32> to vector<256x128xbf16>
    %c0_23 = arith.constant 0 : index
    %c0_24 = arith.constant 0 : index
    %34 = vector.load %arg10[%c0_23, %c0_24] : memref<256x128xbf16, #tpu.memory_space<vmem>>, vector<256x128xbf16>
    tpu.vector_store %arg10[%c0_23, %c0_24], %33 {strides = array<i32>} : memref<256x128xbf16, #tpu.memory_space<vmem>>, vector<256x128xbf16>,
    return
  }
  func.func @transform_0(%arg0: i32) -> (i32, i32) {
    %c0_i32 = arith.constant 0 : i32
    %c0_i32_0 = arith.constant 0 : i32
    return %arg0, %c0_i32 : i32, i32
  }
  func.func @transform_1(%arg0: i32) -> (i32, i32) {
    %c0_i32 = arith.constant 0 : i32
    %c0_i32_0 = arith.constant 0 : i32
    %c0_i32_1 = arith.constant 0 : i32
    return %c0_i32, %c0_i32_0 : i32, i32
  }
  func.func @transform_2(%arg0: i32) -> (i32, i32) {
    %c0_i32 = arith.constant 0 : i32
    %c0_i32_0 = arith.constant 0 : i32
    %c0_i32_1 = arith.constant 0 : i32
    return %c0_i32, %c0_i32_0 : i32, i32
  }
  func.func @transform_3(%arg0: i32) -> (i32, i32) {
    %c0_i32 = arith.constant 0 : i32
    %c0_i32_0 = arith.constant 0 : i32
    %c0_i32_1 = arith.constant 0 : i32
    return %c0_i32, %c0_i32_0 : i32, i32
  }
  func.func @transform_4(%arg0: i32) -> (i32, i32) {
    %c0_i32 = arith.constant 0 : i32
    %c0_i32_0 = arith.constant 0 : i32
    %c0_i32_1 = arith.constant 0 : i32
    return %c0_i32, %c0_i32_0 : i32, i32
  }
  func.func @transform_5(%arg0: i32) -> (i32, i32) {
    %c0_i32 = arith.constant 0 : i32
    %c0_i32_0 = arith.constant 0 : i32
    %c0_i32_1 = arith.constant 0 : i32
    return %c0_i32, %c0_i32_0 : i32, i32
  }
  func.func @transform_6(%arg0: i32) -> (i32, i32) {
    %c0_i32 = arith.constant 0 : i32
    %c0_i32_0 = arith.constant 0 : i32
    %c0_i32_1 = arith.constant 0 : i32
    return %c0_i32, %c0_i32_0 : i32, i32
  }
  func.func @transform_7(%arg0: i32) -> (i32, i32) {
    %c0_i32 = arith.constant 0 : i32
    %c0_i32_0 = arith.constant 0 : i32
    %c0_i32_1 = arith.constant 0 : i32
    return %c0_i32, %c0_i32_0 : i32, i32
  }
  func.func @transform_8(%arg0: i32) -> (i32, i32) {
    %c0_i32 = arith.constant 0 : i32
    %c0_i32_0 = arith.constant 0 : i32
    %c0_i32_1 = arith.constant 0 : i32
    return %c0_i32, %c0_i32_0 : i32, i32
  }
  func.func @transform_9(%arg0: i32) -> (i32, i32) {
    %c0_i32 = arith.constant 0 : i32
    %c0_i32_0 = arith.constant 0 : i32
    return %arg0, %c0_i32 : i32, i32
  }
}

</mosaic_0001>

<bundles_post_ra>
// kernel: tpu_custom_call.1
= control target key start
LH: loop header
LB: loop body
LE: loop exit
PB: predicated region body
PF: predicated region fallthrough
CT: control target
= control target key end

     0   :  { %14 = vsyncpa [#allocation3], 0  ;;  %s2971_s0 = inlined_call_operand.vmem [shape: bf16[512,16], index: 0, kind: input, shape index: {}]   ;;  %s2972_s1 = inlined_call_operand.vmem [shape: bf16[16,128], index: 1, kind: input, shape index: {}]   ;;  %s2973_s2 = inlined_call_operand.vmem [shape: f32[1,128], index: 2, kind: input, shape index: {}]   ;;  %s2974_s3 = inlined_call_operand.vmem [shape: bf16[128,128], index: 3, kind: input, shape index: {}]   ;;  %s2975_s4 = inlined_call_operand.vmem [shape: f32[1,128], index: 4, kind: input, shape index: {}]   ;;  %s2976_s5 = inlined_call_operand.vmem [shape: bf16[128,128], index: 5, kind: input, shape index: {}]   ;;  %s2977_s6 = inlined_call_operand.vmem [shape: f32[1,128], index: 6, kind: input, shape index: {}]   ;;  %s2978_s7 = inlined_call_operand.vmem [shape: bf16[128,128], index: 7, kind: input, shape index: {}]   ;;  %s2979_s8 = inlined_call_operand.vmem [shape: f32[1,128], index: 8, kind: input, shape index: {}]   ;;  %s2980_s9 = inlined_call_operand.hbm [shape: bf16[512,128], index: 9, kind: output, shape index: {}]  }
   0x1   :  { %16 = vsyncpa [#allocation3 + $0x1], 0  ;;  %s2559_s30 = smov 0   ;;  %s2561_s10 = smov 0  }
   0x2   :  { %s2563_s11 = smov 0   ;;  %s2565_s12 = smov 0  }
   0x3 LB: > { %s2580_s13 = sadd.s32 4294967295, %s2504_s12   ;;  %s1844_s14 = sadd.s32 4294967294, %s2504_s12   ;;  %s2504_s12 = sphi %s2565_s12, %s2986_s12   ;;  %s2500_s11 = sphi %s2563_s11, %s2985_s11   ;;  %s2496_s10 = sphi %s2561_s10, %s2984_s10   ;;  %s2492_s30 = sphi %s2559_s30, %s2983_s30  }
   0x4   : > { %s2584_s15 = sadd.s32 1, %s2504_s12   ;;  %s223_s16 = sadd.s32 1, %s2500_s11 }
   0x5   : > { %s220_s17 = ssub.s32 %s2504_s12, %s2584_s15  ;;  %p233_p0 = scmp.ne.s32.totalorder %s2500_s11, %s2496_s10 }
   0x6   : > { %p221_p1 = scmp.eq.s32.totalorder %s220_s17, 0  ;;  %p234_p2 = scmp.eq.s32.totalorder %s2580_s13, 1 }
   0x7   : > { %p239_p3 = scmp.ne.s32.totalorder %s2496_s10, %s2492_s30  ;;  %p240_p4 = scmp.eq.s32.totalorder %s1844_s14, 1 }
   0x8   : > { %s2595_s18 = scalar_select %p221_p1, %s2500_s11, %s223_s16  }
   0x9   : > { %p2597_p5 = por %p234_p2, %p233_p0  ;;  %p2601_p6 = por %p240_p4, %p239_p3 }
   0xa   : > { %p1847_p7 = scmp.ge.s32.totalorder %s2504_s12, 1  ;;  %p291_p8 = scmp.lt.s32.totalorder %s2504_s12, 3 }
   0xc   : > { %p292_p9 = pnand %p1847_p7, %p291_p8 }
   0xd   : > { %v2401_v0 = vld [vmem:[%s2972_s1] sm:$0xff] (!%p292_p9)   ;;  %s1849_s23 = sshll.u32 (!%p292_p9), %s2580_s13, 5  ;;  %v2419_v2 = vld [vmem:[%s2974_s3 + $0x8] sm:$0xff] (!%p292_p9)   ;;  %vm462_vm0 = vcmask (!%p292_p9), 130048   ;;  %v2420_v3 = vld [vmem:[%s2974_s3 + $0x10] sm:$0xff] (!%p292_p9)   ;;  %s324_s22 = sand.u32 (!%p292_p9), 1, %s2496_s10  }
   0xe   : > { %295 = sbr.rel (%p292_p9) target bundleno = 988 (0x3dc), region = 56  ;;  %p328_p10 = scmp.lt.s32.totalorder (!%p292_p9), %s1849_s23, 63  ;;  %2166 = vmatprep.subr.bf16.mxu0 (!%p292_p9), %v2401_v0  ;;  %v2418_v1 = vld [vmem:[%s2974_s3] sm:$0xff] (!%p292_p9)   ;;  %v2421_v7 = vld [vmem:[%s2974_s3 + $0x18] sm:$0xff] (!%p292_p9)   ;;  %v2423_v22 = vld [vmem:[%s2974_s3 + $0x28] sm:$0xff] (!%p292_p9)  }
   0xf   : > { %2167 = vmatpush3.bf16.msra.mxu0 (!%p292_p9), %v2401_v0  ;;  %2200 = vmatprep.subr.bf16.mxu1 (!%p292_p9), %v2418_v1  ;;  %v2422_v8 = vld [vmem:[%s2974_s3 + $0x20] sm:$0xff] (!%p292_p9)   ;;  %v2424_v23 = vld [vmem:[%s2974_s3 + $0x30] sm:$0xff] (!%p292_p9)   ;;  %v2425_v24 = vld [vmem:[%s2974_s3 + $0x38] sm:$0xff] (!%p292_p9)   ;;  %s1848_s25 = sshll.u32 (!%p292_p9), %s324_s22, 7  ;;  %s1981_s27 = sshll.u32 (!%p292_p9), %s2580_s13, 11 }
  0x10   : > { %2201 = vmatpush3.bf16.msra.mxu1 (!%p292_p9), %v2418_v1  ;;  %v2426_v25 = vld [vmem:[%s2976_s5] sm:$0xff] (!%p292_p9)   ;;  %v2427_v26 = vld [vmem:[%s2976_s5 + $0x8] sm:$0xff] (!%p292_p9)   ;;  %v2428_v27 = vld [vmem:[%s2976_s5 + $0x10] sm:$0xff] (!%p292_p9)   ;;  %s2873_s26 = scalar_lea.vmem (!%p292_p9), [#allocation2], %s1848_s25  ;;  %s2922_s17 = scalar_lea.hbm (!%p292_p9), %s2980_s9, %s1981_s27 }
  0x11   : > { %2202 = vmatprep.subr.bf16.mxu1 (!%p292_p9), %v2419_v2  ;;  %2248 = vmatprep.subr.bf16.mxu0 (!%p292_p9), %v2426_v25  ;;  %v2429_v28 = vld [vmem:[%s2976_s5 + $0x18] sm:$0xff] (!%p292_p9)   ;;  %v2430_v29 = vld [vmem:[%s2976_s5 + $0x20] sm:$0xff] (!%p292_p9)   ;;  %v2431_v30 = vld [vmem:[%s2976_s5 + $0x28] sm:$0xff] (!%p292_p9)   ;;  %s2930_s13 = scalar_lea.sflag (!%p292_p9), [#allocation3], %s324_s22  ;;  %s2506_s21 = smov (!%p292_p9), [#allocation2]  }
  0x12   : > { %v2432_v31 = vld [vmem:[%s2976_s5 + $0x30] sm:$0xff] (!%p292_p9)   ;;  %v2696_v32 = vld [vmem:[%s2973_s2] ss:$0 sm:$0xff] (!%p292_p9) }
  0x14   : > { %2203 = vmatpush3.bf16.msra.mxu1 (!%p292_p9), %v2419_v2 }
  0x15   : > { %s2988_s23 = smov (!%p328_p10, %s1849_s23), 63  ;;  %2204 = vmatprep.subr.bf16.mxu1 %v2420_v3 }
  0x16   : > { %s1850_s28 = sshll.u32 %s2988_s23, 2  ;;  %s2446_s23 = sshll.u32 %s2506_s21, 4  ;;  %s2447_s23 = int_to_ptr.vmem [resolvable:$false] %s2446_s23 }
  0x17   : > { %s2620_s16 = scalar_lea.vmem %s2971_s0, %s1850_s28  ;;  %s1782_s28 = sshll.u32 %s2873_s26, 4  ;;  %s2924_s28 = int_to_ptr.vmem [resolvable:$true] %s1782_s28 }
  0x18   : > { %v2402_v4 = vld [vmem:[%s2620_s16] sm:$0xff]   ;;  %v2403_v5 = vld [vmem:[%s2620_s16 + $0x8] sm:$0xff]   ;;  %v2404_v6 = vld [vmem:[%s2620_s16 + $0x10] sm:$0xff]   ;;  %2205 = vmatpush3.bf16.msra.mxu1 %v2420_v3  ;;  %s2448_s24 = scalar_lea.vmem %s2447_s23, 4096  ;;  %p2449_p0 = scmp.lt.s32.totalorder %s2924_s28, %s2447_s23 }
  0x19   : > { %2168 = vmatprep.mubr.msk.bf16.mxu0 %vm462_vm0, %v2402_v4  ;;  %v2405_v9 = vld [vmem:[%s2620_s16 + $0x18] sm:$0xff]   ;;  %2206 = vmatprep.subr.bf16.mxu1 %v2421_v7  ;;  %v2406_v10 = vld [vmem:[%s2620_s16 + $0x20] sm:$0xff]   ;;  %v2407_v11 = vld [vmem:[%s2620_s16 + $0x28] sm:$0xff]  }
  0x1a   : > { %2169 = vmatmul.mubr.msk.bf16.vlgmr.msra.gmra.mrb[0].mxu0 %vm462_vm0, %v2403_v5  ;;  %v2408_v12 = vld [vmem:[%s2620_s16 + $0x30] sm:$0xff]   ;;  %v2409_v13 = vld [vmem:[%s2620_s16 + $0x38] sm:$0xff]   ;;  %v2410_v14 = vld [vmem:[%s2620_s16 + $0x40] sm:$0xff]  }
  0x1b   : > { %2172 = vmatprep.mubr.msk.bf16.mxu0 %vm462_vm0, %v2404_v6  ;;  %v2411_v15 = vld [vmem:[%s2620_s16 + $0x48] sm:$0xff]   ;;  %v2412_v16 = vld [vmem:[%s2620_s16 + $0x50] sm:$0xff]   ;;  %v2413_v17 = vld [vmem:[%s2620_s16 + $0x58] sm:$0xff]   ;;  %2249 = vmatpush3.bf16.msra.mxu0 %v2426_v25 }
  0x1c   : > { %2207 = vmatpush3.bf16.msra.mxu1 %v2421_v7  ;;  %v2414_v18 = vld [vmem:[%s2620_s16 + $0x60] sm:$0xff]   ;;  %v2415_v19 = vld [vmem:[%s2620_s16 + $0x68] sm:$0xff]   ;;  %v2416_v20 = vld [vmem:[%s2620_s16 + $0x70] sm:$0xff]   ;;  %2250 = vmatprep.subr.bf16.mxu0 %v2427_v26 }
  0x1d   : > { %2208 = vmatprep.subr.bf16.mxu1 %v2422_v8  ;;  %v2417_v21 = vld [vmem:[%s2620_s16 + $0x78] sm:$0xff]   ;;  %s2442_s16 = scalar_lea.vmem %s2924_s28, 2048 }
  0x1e   : > { %p2443_p11 = scmp.ne.s32.totalorder %s2924_s28, %s2442_s16  ;;  %p2450_p1 = scmp.lt.s32.totalorder %s2448_s24, %s2442_s16 }
  0x1f   : > { %2251 = vmatpush3.bf16.msra.mxu0 %v2427_v26 }
  0x20   : > { %2209 = vmatpush3.bf16.msra.mxu1 %v2422_v8  ;;  %2252 = vmatprep.subr.bf16.mxu0 %v2428_v27  ;;  %p2444_p12 = pnand %p2443_p11, %p2597_p5  ;;  %p2451_p2 = por %p2450_p1, %p2449_p0 }
  0x21   : > { %2210 = vmatprep.subr.bf16.mxu1 %v2423_v22 }
  0x22   : > { %2173 = vmatmul.mubr.msk.bf16.gmra.mrb[4].mxu0 %vm462_vm0, %v2405_v9  ;;  %p2445_p13 = pneg %p2444_p12 }
  0x23   : > { %2176 = vmatprep.mubr.msk.bf16.mxu0 %vm462_vm0, %v2406_v10  ;;  %2253 = vmatpush3.bf16.msra.mxu0 %v2428_v27 }
  0x24   : > { %2211 = vmatpush3.bf16.msra.mxu1 %v2423_v22  ;;  %2254 = vmatprep.subr.bf16.mxu0 %v2429_v28  ;;  %p2452_p3 = pnand %p2451_p2, %p2445_p13 }
  0x25   : > { %2212 = vmatprep.subr.bf16.mxu1 %v2424_v23 }
  0x27   : > { %2255 = vmatpush3.bf16.msra.mxu0 %v2429_v28 }
  0x28   : > { %2213 = vmatpush3.bf16.msra.mxu1 %v2424_v23  ;;  %2256 = vmatprep.subr.bf16.mxu0 %v2430_v29 }
  0x29   : > { %2214 = vmatprep.subr.bf16.mxu1 %v2425_v24 }
  0x2a   : > { %2177 = vmatmul.mubr.msk.bf16.gmra.mrb[8].mxu0 %vm462_vm0, %v2407_v11 }
  0x2b   : > { %2180 = vmatprep.mubr.msk.bf16.mxu0 %vm462_vm0, %v2408_v12  ;;  %2257 = vmatpush3.bf16.msra.mxu0 %v2430_v29 }
  0x2c   : > { %2215 = vmatpush3.bf16.msra.mxu1 %v2425_v24  ;;  %2258 = vmatprep.subr.bf16.mxu0 %v2431_v30 }
  0x2f   : > { %2259 = vmatpush3.bf16.msra.mxu0 %v2431_v30 }
  0x30   : > { %2260 = vmatprep.subr.bf16.mxu0 %v2432_v31 }
  0x32   : > { %2181 = vmatmul.mubr.msk.bf16.gmra.mrb[12].mxu0 %vm462_vm0, %v2409_v13 }
  0x33   : > { %2184 = vmatprep.mubr.msk.bf16.mxu0 %vm462_vm0, %v2410_v14  ;;  %2261 = vmatpush3.bf16.msra.mxu0 %v2432_v31 }
  0x3a   : > { %2185 = vmatmul.mubr.msk.bf16.gmra.mrb[16].mxu0 %vm462_vm0, %v2411_v15 }
  0x3b   : > { %2188 = vmatprep.mubr.msk.bf16.mxu0 %vm462_vm0, %v2412_v16 }
  0x42   : > { %2189 = vmatmul.mubr.msk.bf16.gmra.mrb[20].mxu0 %vm462_vm0, %v2413_v17 }
  0x43   : > { %2192 = vmatprep.mubr.msk.bf16.mxu0 %vm462_vm0, %v2414_v18 }
  0x4a   : > { %2193 = vmatmul.mubr.msk.bf16.gmra.mrb[24].mxu0 %vm462_vm0, %v2415_v19 }
  0x4b   : > { %2196 = vmatprep.mubr.msk.bf16.mxu0 %vm462_vm0, %v2416_v20 }
  0x52   : > { %2197 = vmatmul.mubr.msk.bf16.gmra.mrb[28].mxu0 %vm462_vm0, %v2417_v21 }
  0xed   : > { %v2170_v33 = vpop.f32.mrb[0].mxu0 }
  0xee   : > { %v554_v34 = vadd.f32 %v2170_v33, %v2696_v32  ;;  %v545_v35 = vpop.f32.mrb[1].mxu0 }
  0xef   : > { %v546_v36 = vadd.f32 %v2696_v32, %v545_v35  ;;  %v2171_v37 = vpop.f32.mrb[2].mxu0 }
  0xf0   : > { %v674_v38 = vmul.f32 0.01, %v554_v34  ;;  %v557_v39 = vadd.f32 %v2171_v37, %v2696_v32  ;;  %v548_v40 = vpop.f32.mrb[3].mxu0 }
  0xf1   : > { %v672_v41 = vmul.f32 0.01, %v546_v36  ;;  %v549_v42 = vadd.f32 %v2696_v32, %v548_v40 }
  0xf2   : > { %v675_v43 = vmul.f32 0.01, %v557_v39  ;;  %v706_v45 = vmax.f32 %v554_v34, %v674_v38 }
  0xf3   : > { %v673_v44 = vmul.f32 0.01, %v549_v42  ;;  %v704_v48 = vmax.f32 %v546_v36, %v672_v41 }
  0xf4   : > { %v707_v46 = vmax.f32 %v557_v39, %v675_v43 }
  0xf5   : > { %v2174_v47 = vpop.f32.mrb[4].mxu0  ;;  %v705_v49 = vmax.f32 %v549_v42, %v673_v44 }
  0xf6   : > { %v570_v50 = vadd.f32 %v2174_v47, %v2696_v32  ;;  %v561_v51 = vpop.f32.mrb[5].mxu0  ;;  %v737_v52 = vpack.c.bf16 %v707_v46, %v706_v45 }
  0xf7   : > { %v562_v53 = vadd.f32 %v2696_v32, %v561_v51  ;;  %v2175_v54 = vpop.f32.mrb[6].mxu0  ;;  %v736_v55 = vpack.c.bf16 %v705_v49, %v704_v48 }
  0xf8   : > { %v678_v56 = vmul.f32 0.01, %v570_v50  ;;  %v573_v57 = vadd.f32 %v2175_v54, %v2696_v32  ;;  %v564_v58 = vpop.f32.mrb[7].mxu0 }
  0xf9   : > { %v676_v59 = vmul.f32 0.01, %v562_v53  ;;  %v565_v60 = vadd.f32 %v2696_v32, %v564_v58  ;;  %2216 = vmatprep.mubr.bf16.mxu1 %v736_v55 }
  0xfa   : > { %v679_v61 = vmul.f32 0.01, %v573_v57  ;;  %2217 = vmatmul.mubr.bf16.vlgmr.msra.gmra.mrb[0].mxu1 %v737_v52  ;;  %v710_v63 = vmax.f32 %v570_v50, %v678_v56 }
  0xfb   : > { %v677_v62 = vmul.f32 0.01, %v565_v60  ;;  %v708_v1 = vmax.f32 %v562_v53, %v676_v59 }
  0xfc   : > { %v711_v0 = vmax.f32 %v573_v57, %v679_v61 }
  0xfd   : > { %v709_v2 = vmax.f32 %v565_v60, %v677_v62  ;;  %v2178_v3 = vpop.f32.mrb[8].mxu0 }
  0xfe   : > { %v586_v4 = vadd.f32 %v2178_v3, %v2696_v32  ;;  %v577_v5 = vpop.f32.mrb[9].mxu0  ;;  %v739_v6 = vpack.c.bf16 %v711_v0, %v710_v63 }
  0xff   : > { %v578_v7 = vadd.f32 %v2696_v32, %v577_v5  ;;  %v2179_v8 = vpop.f32.mrb[10].mxu0  ;;  %v738_v9 = vpack.c.bf16 %v709_v2, %v708_v1 }
 0x100   : > { %v682_v10 = vmul.f32 0.01, %v586_v4  ;;  %v589_v11 = vadd.f32 %v2179_v8, %v2696_v32  ;;  %v580_v12 = vpop.f32.mrb[11].mxu0 }
 0x101   : > { %v680_v13 = vmul.f32 0.01, %v578_v7  ;;  %v581_v14 = vadd.f32 %v2696_v32, %v580_v12  ;;  %2220 = vmatprep.mubr.bf16.mxu1 %v738_v9 }
 0x102   : > { %v683_v15 = vmul.f32 0.01, %v589_v11  ;;  %2221 = vmatmul.mubr.bf16.gmra.mrb[4].mxu1 %v739_v6  ;;  %v714_v17 = vmax.f32 %v586_v4, %v682_v10 }
 0x103   : > { %v681_v16 = vmul.f32 0.01, %v581_v14  ;;  %v712_v19 = vmax.f32 %v578_v7, %v680_v13 }
 0x104   : > { %v715_v18 = vmax.f32 %v589_v11, %v683_v15 }
 0x105   : > { %v713_v20 = vmax.f32 %v581_v14, %v681_v16  ;;  %v2182_v21 = vpop.f32.mrb[12].mxu0 }
 0x106   : > { %v602_v22 = vadd.f32 %v2182_v21, %v2696_v32  ;;  %v593_v23 = vpop.f32.mrb[13].mxu0  ;;  %v741_v24 = vpack.c.bf16 %v715_v18, %v714_v17 }
 0x107   : > { %v594_v25 = vadd.f32 %v2696_v32, %v593_v23  ;;  %v2183_v26 = vpop.f32.mrb[14].mxu0  ;;  %v740_v27 = vpack.c.bf16 %v713_v20, %v712_v19 }
 0x108   : > { %v686_v28 = vmul.f32 0.01, %v602_v22  ;;  %v605_v29 = vadd.f32 %v2183_v26, %v2696_v32  ;;  %v596_v30 = vpop.f32.mrb[15].mxu0 }
 0x109   : > { %v684_v31 = vmul.f32 0.01, %v594_v25  ;;  %v597_v33 = vadd.f32 %v2696_v32, %v596_v30  ;;  %2224 = vmatprep.mubr.bf16.mxu1 %v740_v27 }
 0x10a   : > { %v687_v34 = vmul.f32 0.01, %v605_v29  ;;  %2225 = vmatmul.mubr.bf16.gmra.mrb[8].mxu1 %v741_v24  ;;  %v718_v36 = vmax.f32 %v602_v22, %v686_v28 }
 0x10b   : > { %v685_v35 = vmul.f32 0.01, %v597_v33  ;;  %v716_v38 = vmax.f32 %v594_v25, %v684_v31 }
 0x10c   : > { %v719_v37 = vmax.f32 %v605_v29, %v687_v34 }
 0x10d   : > { %v717_v39 = vmax.f32 %v597_v33, %v685_v35  ;;  %v2186_v40 = vpop.f32.mrb[16].mxu0 }
 0x10e   : > { %v618_v41 = vadd.f32 %v2186_v40, %v2696_v32  ;;  %v609_v42 = vpop.f32.mrb[17].mxu0  ;;  %v743_v43 = vpack.c.bf16 %v719_v37, %v718_v36 }
 0x10f   : > { %v610_v44 = vadd.f32 %v2696_v32, %v609_v42  ;;  %v2187_v45 = vpop.f32.mrb[18].mxu0  ;;  %v742_v46 = vpack.c.bf16 %v717_v39, %v716_v38 }
 0x110   : > { %v690_v47 = vmul.f32 0.01, %v618_v41  ;;  %v621_v48 = vadd.f32 %v2187_v45, %v2696_v32  ;;  %v612_v49 = vpop.f32.mrb[19].mxu0 }
 0x111   : > { %v688_v50 = vmul.f32 0.01, %v610_v44  ;;  %v613_v51 = vadd.f32 %v2696_v32, %v612_v49  ;;  %2228 = vmatprep.mubr.bf16.mxu1 %v742_v46 }
 0x112   : > { %v691_v52 = vmul.f32 0.01, %v621_v48  ;;  %2229 = vmatmul.mubr.bf16.gmra.mrb[12].mxu1 %v743_v43  ;;  %v722_v54 = vmax.f32 %v618_v41, %v690_v47 }
 0x113   : > { %v689_v53 = vmul.f32 0.01, %v613_v51  ;;  %v720_v56 = vmax.f32 %v610_v44, %v688_v50 }
 0x114   : > { %v723_v55 = vmax.f32 %v621_v48, %v691_v52  ;;  %v2739_v52 = vld [vmem:[%s2978_s7 + $0x8] sm:$0xff]  }
 0x115   : > { %v721_v57 = vmax.f32 %v613_v51, %v689_v53  ;;  %v2190_v58 = vpop.f32.mrb[20].mxu0  ;;  %v2433_v51 = vld [vmem:[%s2976_s5 + $0x38] sm:$0xff]   ;;  %v2745_v53 = vld [vmem:[%s2978_s7 + $0x10] sm:$0xff]  }
 0x116   : > { %v634_v59 = vadd.f32 %v2190_v58, %v2696_v32  ;;  %v625_v60 = vpop.f32.mrb[21].mxu0  ;;  %v745_v61 = vpack.c.bf16 %v723_v55, %v722_v54  ;;  %2262 = vmatprep.subr.bf16.mxu0 %v2433_v51  ;;  %v2752_v54 = vld [vmem:[%s2978_s7 + $0x18] sm:$0xff]   ;;  %v2759_v55 = vld [vmem:[%s2978_s7 + $0x20] sm:$0xff]  }
 0x117   : > { %v626_v62 = vadd.f32 %v2696_v32, %v625_v60  ;;  %v2191_v63 = vpop.f32.mrb[22].mxu0  ;;  %v744_v0 = vpack.c.bf16 %v721_v57, %v720_v56  ;;  %2263 = vmatpush3.bf16.msra.mxu0 %v2433_v51  ;;  %v2766_v56 = vld [vmem:[%s2978_s7 + $0x28] sm:$0xff]   ;;  %v2774_v57 = vld [vmem:[%s2975_s4] ss:$0 sm:$0xff] }
 0x118   : > { %v694_v1 = vmul.f32 0.01, %v634_v59  ;;  %v637_v2 = vadd.f32 %v2191_v63, %v2696_v32  ;;  %v628_v3 = vpop.f32.mrb[23].mxu0 }
 0x119   : > { %v692_v4 = vmul.f32 0.01, %v626_v62  ;;  %v629_v5 = vadd.f32 %v2696_v32, %v628_v3  ;;  %2232 = vmatprep.mubr.bf16.mxu1 %v744_v0 }
 0x11a   : > { %v695_v6 = vmul.f32 0.01, %v637_v2  ;;  %2233 = vmatmul.mubr.bf16.gmra.mrb[16].mxu1 %v745_v61  ;;  %v726_v8 = vmax.f32 %v634_v59, %v694_v1 }
 0x11b   : > { %v693_v7 = vmul.f32 0.01, %v629_v5  ;;  %v724_v10 = vmax.f32 %v626_v62, %v692_v4 }
 0x11c   : > { %v727_v9 = vmax.f32 %v637_v2, %v695_v6 }
 0x11d   : > { %v725_v11 = vmax.f32 %v629_v5, %v693_v7  ;;  %v2194_v12 = vpop.f32.mrb[24].mxu0 }
 0x11e   : > { %v650_v13 = vadd.f32 %v2194_v12, %v2696_v32  ;;  %v641_v14 = vpop.f32.mrb[25].mxu0  ;;  %v747_v15 = vpack.c.bf16 %v727_v9, %v726_v8 }
 0x11f   : > { %v642_v16 = vadd.f32 %v2696_v32, %v641_v14  ;;  %v2195_v17 = vpop.f32.mrb[26].mxu0  ;;  %v746_v18 = vpack.c.bf16 %v725_v11, %v724_v10 }
 0x120   : > { %v698_v19 = vmul.f32 0.01, %v650_v13  ;;  %v653_v20 = vadd.f32 %v2195_v17, %v2696_v32  ;;  %v644_v21 = vpop.f32.mrb[27].mxu0 }
 0x121   : > { %v696_v22 = vmul.f32 0.01, %v642_v16  ;;  %v645_v23 = vadd.f32 %v2696_v32, %v644_v21  ;;  %2236 = vmatprep.mubr.bf16.mxu1 %v746_v18 }
 0x122   : > { %v699_v24 = vmul.f32 0.01, %v653_v20  ;;  %2237 = vmatmul.mubr.bf16.gmra.mrb[20].mxu1 %v747_v15  ;;  %v730_v26 = vmax.f32 %v650_v13, %v698_v19 }
 0x123   : > { %v697_v25 = vmul.f32 0.01, %v645_v23  ;;  %v728_v28 = vmax.f32 %v642_v16, %v696_v22 }
 0x124   : > { %v731_v27 = vmax.f32 %v653_v20, %v699_v24 }
 0x125   : > { %v729_v29 = vmax.f32 %v645_v23, %v697_v25  ;;  %v2198_v30 = vpop.f32.mrb[28].mxu0 }
 0x126   : > { %v666_v31 = vadd.f32 %v2198_v30, %v2696_v32  ;;  %v657_v33 = vpop.f32.mrb[29].mxu0  ;;  %v749_v34 = vpack.c.bf16 %v731_v27, %v730_v26 }
 0x127   : > { %v658_v35 = vadd.f32 %v2696_v32, %v657_v33  ;;  %v2199_v36 = vpop.f32.mrb[30].mxu0  ;;  %v748_v37 = vpack.c.bf16 %v729_v29, %v728_v28 }
 0x128   : > { %v702_v38 = vmul.f32 0.01, %v666_v31  ;;  %v669_v39 = vadd.f32 %v2199_v36, %v2696_v32  ;;  %v660_v40 = vpop.f32.mrb[31].mxu0 }
 0x129   : > { %v700_v41 = vmul.f32 0.01, %v658_v35  ;;  %v661_v42 = vadd.f32 %v2696_v32, %v660_v40  ;;  %2240 = vmatprep.mubr.bf16.mxu1 %v748_v37  ;;  %v2434_v32 = vld [vmem:[%s2978_s7] sm:$0xff]  }
 0x12a   : > { %v703_v43 = vmul.f32 0.01, %v669_v39  ;;  %2241 = vmatmul.mubr.bf16.gmra.mrb[24].mxu1 %v749_v34  ;;  %v734_v45 = vmax.f32 %v666_v31, %v702_v38  ;;  %2344 = vmatprep.subr.bf16.mxu1 %v2434_v32 }
 0x12b   : > { %v701_v44 = vmul.f32 0.01, %v661_v42  ;;  %v732_v47 = vmax.f32 %v658_v35, %v700_v41  ;;  %2296 = vmatprep.subr.bf16.mxu0 %v2434_v32  ;;  %2352 = vmatpush3.bf16.msra.mxu1 %v2434_v32 }
 0x12c   : > { %v735_v46 = vmax.f32 %v669_v39, %v703_v43  ;;  %2345 = vmatprep.subr.bf16.mxu1 %v2739_v52 }
 0x12d   : > { %v733_v48 = vmax.f32 %v661_v42, %v701_v44 }
 0x12e   : > { %v751_v49 = vpack.c.bf16 %v735_v46, %v734_v45 }
 0x12f   : > { %v750_v50 = vpack.c.bf16 %v733_v48, %v732_v47  ;;  %2353 = vmatpush3.bf16.msra.mxu1 %v2739_v52 }
 0x130   : > { %2346 = vmatprep.subr.bf16.mxu1 %v2745_v53 }
 0x131   : > { %2244 = vmatprep.mubr.bf16.mxu1 %v750_v50 }
 0x132   : > { %2245 = vmatmul.mubr.bf16.gmra.mrb[28].mxu1 %v751_v49 }
 0x133   : > { %2354 = vmatpush3.bf16.msra.mxu1 %v2745_v53 }
 0x134   : > { %2347 = vmatprep.subr.bf16.mxu1 %v2752_v54 }
 0x137   : > { %2355 = vmatpush3.bf16.msra.mxu1 %v2752_v54 }
 0x138   : > { %2348 = vmatprep.subr.bf16.mxu1 %v2759_v55 }
 0x13b   : > { %2356 = vmatpush3.bf16.msra.mxu1 %v2759_v55 }
 0x13c   : > { %2349 = vmatprep.subr.bf16.mxu1 %v2766_v56 }
 0x13f   : > { %2357 = vmatpush3.bf16.msra.mxu1 %v2766_v56 }
 0x1cd   : > { %v2218_v58 = vpop.f32.mrb[0].mxu1 }
 0x1ce   : > { %v866_v59 = vadd.f32 %v2218_v58, %v2774_v57  ;;  %v857_v60 = vpop.f32.mrb[1].mxu1 }
 0x1cf   : > { %v858_v61 = vadd.f32 %v2774_v57, %v857_v60  ;;  %v2219_v62 = vpop.f32.mrb[2].mxu1 }
 0x1d0   : > { %v986_v63 = vmul.f32 0.01, %v866_v59  ;;  %v869_v0 = vadd.f32 %v2219_v62, %v2774_v57  ;;  %v860_v1 = vpop.f32.mrb[3].mxu1 }
 0x1d1   : > { %v984_v2 = vmul.f32 0.01, %v858_v61  ;;  %v861_v3 = vadd.f32 %v2774_v57, %v860_v1 }
 0x1d2   : > { %v987_v4 = vmul.f32 0.01, %v869_v0  ;;  %v1018_v6 = vmax.f32 %v866_v59, %v986_v63 }
 0x1d3   : > { %v985_v5 = vmul.f32 0.01, %v861_v3  ;;  %v1016_v8 = vmax.f32 %v858_v61, %v984_v2 }
 0x1d4   : > { %v1019_v7 = vmax.f32 %v869_v0, %v987_v4 }
 0x1d5   : > { %v1017_v9 = vmax.f32 %v861_v3, %v985_v5  ;;  %v2222_v10 = vpop.f32.mrb[4].mxu1 }
 0x1d6   : > { %v1049_v11 = vpack.c.bf16 %v1019_v7, %v1018_v6  ;;  %v882_v12 = vadd.f32 %v2222_v10, %v2774_v57  ;;  %v873_v13 = vpop.f32.mrb[5].mxu1 }
 0x1d7   : > { %v874_v14 = vadd.f32 %v2774_v57, %v873_v13  ;;  %v2223_v15 = vpop.f32.mrb[6].mxu1  ;;  %v1048_v16 = vpack.c.bf16 %v1017_v9, %v1016_v8 }
 0x1d8   : > { %v990_v17 = vmul.f32 0.01, %v882_v12  ;;  %v885_v18 = vadd.f32 %v2223_v15, %v2774_v57  ;;  %v876_v19 = vpop.f32.mrb[7].mxu1 }
 0x1d9   : > { %v988_v20 = vmul.f32 0.01, %v874_v14  ;;  %v877_v21 = vadd.f32 %v2774_v57, %v876_v19  ;;  %2264 = vmatprep.mubr.bf16.mxu0 %v1048_v16 }
 0x1da   : > { %v991_v22 = vmul.f32 0.01, %v885_v18  ;;  %2265 = vmatmul.mubr.bf16.vlgmr.msra.gmra.mrb[32].mxu0 %v1049_v11  ;;  %v1022_v24 = vmax.f32 %v882_v12, %v990_v17 }
 0x1db   : > { %v989_v23 = vmul.f32 0.01, %v877_v21  ;;  %2297 = vmatpush3.bf16.msra.mxu0 %v2434_v32  ;;  %v1020_v26 = vmax.f32 %v874_v14, %v988_v20 }
 0x1dc   : > { %v1023_v25 = vmax.f32 %v885_v18, %v991_v22  ;;  %2298 = vmatprep.subr.bf16.mxu0 %v2739_v52 }
 0x1dd   : > { %v1021_v27 = vmax.f32 %v877_v21, %v989_v23  ;;  %v2226_v28 = vpop.f32.mrb[8].mxu1 }
 0x1de   : > { %v898_v29 = vadd.f32 %v2226_v28, %v2774_v57  ;;  %v889_v30 = vpop.f32.mrb[9].mxu1  ;;  %v1051_v31 = vpack.c.bf16 %v1023_v25, %v1022_v24 }
 0x1df   : > { %v890_v33 = vadd.f32 %v2774_v57, %v889_v30  ;;  %v2227_v34 = vpop.f32.mrb[10].mxu1  ;;  %v1050_v35 = vpack.c.bf16 %v1021_v27, %v1020_v26  ;;  %2299 = vmatpush3.bf16.msra.mxu0 %v2739_v52 }
 0x1e0   : > { %v994_v36 = vmul.f32 0.01, %v898_v29  ;;  %v901_v37 = vadd.f32 %v2227_v34, %v2774_v57  ;;  %v892_v38 = vpop.f32.mrb[11].mxu1  ;;  %2300 = vmatprep.subr.bf16.mxu0 %v2745_v53 }
 0x1e1   : > { %v992_v39 = vmul.f32 0.01, %v890_v33  ;;  %v893_v40 = vadd.f32 %v2774_v57, %v892_v38  ;;  %2268 = vmatprep.mubr.bf16.mxu0 %v1050_v35 }
 0x1e2   : > { %v995_v41 = vmul.f32 0.01, %v901_v37  ;;  %2269 = vmatmul.mubr.bf16.gmra.mrb[36].mxu0 %v1051_v31  ;;  %v1026_v43 = vmax.f32 %v898_v29, %v994_v36 }
 0x1e3   : > { %v993_v42 = vmul.f32 0.01, %v893_v40  ;;  %2301 = vmatpush3.bf16.msra.mxu0 %v2745_v53  ;;  %v1024_v45 = vmax.f32 %v890_v33, %v992_v39 }
 0x1e4   : > { %v1027_v44 = vmax.f32 %v901_v37, %v995_v41  ;;  %2302 = vmatprep.subr.bf16.mxu0 %v2752_v54 }
 0x1e5   : > { %v1025_v46 = vmax.f32 %v893_v40, %v993_v42  ;;  %v2230_v47 = vpop.f32.mrb[12].mxu1 }
 0x1e6   : > { %v914_v48 = vadd.f32 %v2230_v47, %v2774_v57  ;;  %v905_v49 = vpop.f32.mrb[13].mxu1  ;;  %v1053_v50 = vpack.c.bf16 %v1027_v44, %v1026_v43 }
 0x1e7   : > { %v906_v51 = vadd.f32 %v2774_v57, %v905_v49  ;;  %v2231_v32 = vpop.f32.mrb[14].mxu1  ;;  %v1052_v52 = vpack.c.bf16 %v1025_v46, %v1024_v45  ;;  %2303 = vmatpush3.bf16.msra.mxu0 %v2752_v54 }
 0x1e8   : > { %v998_v58 = vmul.f32 0.01, %v914_v48  ;;  %v917_v53 = vadd.f32 %v2231_v32, %v2774_v57  ;;  %v908_v59 = vpop.f32.mrb[15].mxu1  ;;  %2304 = vmatprep.subr.bf16.mxu0 %v2759_v55 }
 0x1e9   : > { %v996_v60 = vmul.f32 0.01, %v906_v51  ;;  %v909_v61 = vadd.f32 %v2774_v57, %v908_v59  ;;  %2272 = vmatprep.mubr.bf16.mxu0 %v1052_v52 }
 0x1ea   : > { %v999_v62 = vmul.f32 0.01, %v917_v53  ;;  %2273 = vmatmul.mubr.bf16.gmra.mrb[40].mxu0 %v1053_v50  ;;  %v1030_v0 = vmax.f32 %v914_v48, %v998_v58 }
 0x1eb   : > { %v997_v63 = vmul.f32 0.01, %v909_v61  ;;  %2305 = vmatpush3.bf16.msra.mxu0 %v2759_v55  ;;  %v1028_v54 = vmax.f32 %v906_v51, %v996_v60 }
 0x1ec   : > { %v1031_v1 = vmax.f32 %v917_v53, %v999_v62  ;;  %2306 = vmatprep.subr.bf16.mxu0 %v2766_v56 }
 0x1ed   : > { %v1029_v2 = vmax.f32 %v909_v61, %v997_v63  ;;  %v2234_v3 = vpop.f32.mrb[16].mxu1 }
 0x1ee   : > { %v930_v4 = vadd.f32 %v2234_v3, %v2774_v57  ;;  %v921_v5 = vpop.f32.mrb[17].mxu1  ;;  %v1055_v6 = vpack.c.bf16 %v1031_v1, %v1030_v0 }
 0x1ef   : > { %v922_v7 = vadd.f32 %v2774_v57, %v921_v5  ;;  %v2235_v8 = vpop.f32.mrb[18].mxu1  ;;  %v1054_v9 = vpack.c.bf16 %v1029_v2, %v1028_v54  ;;  %2307 = vmatpush3.bf16.msra.mxu0 %v2766_v56 }
 0x1f0   : > { %v1002_v10 = vmul.f32 0.01, %v930_v4  ;;  %v933_v55 = vadd.f32 %v2235_v8, %v2774_v57  ;;  %v924_v11 = vpop.f32.mrb[19].mxu1 }
 0x1f1   : > { %v1000_v12 = vmul.f32 0.01, %v922_v7  ;;  %v925_v13 = vadd.f32 %v2774_v57, %v924_v11  ;;  %2276 = vmatprep.mubr.bf16.mxu0 %v1054_v9 }
 0x1f2   : > { %v1003_v14 = vmul.f32 0.01, %v933_v55  ;;  %2277 = vmatmul.mubr.bf16.gmra.mrb[44].mxu0 %v1055_v6  ;;  %v1034_v16 = vmax.f32 %v930_v4, %v1002_v10 }
 0x1f3   : > { %v1001_v15 = vmul.f32 0.01, %v925_v13  ;;  %v1032_v18 = vmax.f32 %v922_v7, %v1000_v12 }
 0x1f4   : > { %v1035_v17 = vmax.f32 %v933_v55, %v1003_v14  ;;  %v2827_v14 = vld [vmem:[%s2977_s6] ss:$0 sm:$0xff] }
 0x1f5   : > { %v1033_v19 = vmax.f32 %v925_v13, %v1001_v15  ;;  %v2238_v20 = vpop.f32.mrb[20].mxu1  ;;  %v2440_v13 = vld [vmem:[%s2978_s7 + $0x30] sm:$0xff]  }
 0x1f6   : > { %v946_v21 = vadd.f32 %v2238_v20, %v2774_v57  ;;  %v937_v22 = vpop.f32.mrb[21].mxu1  ;;  %v1057_v56 = vpack.c.bf16 %v1035_v17, %v1034_v16  ;;  %2350 = vmatprep.subr.bf16.mxu1 %v2440_v13  ;;  %2308 = vmatprep.subr.bf16.mxu0 %v2440_v13 }
 0x1f7   : > { %v938_v23 = vadd.f32 %v2774_v57, %v937_v22  ;;  %v2239_v24 = vpop.f32.mrb[22].mxu1  ;;  %v1056_v25 = vpack.c.bf16 %v1033_v19, %v1032_v18  ;;  %2358 = vmatpush3.bf16.msra.mxu1 %v2440_v13  ;;  %2309 = vmatpush3.bf16.msra.mxu0 %v2440_v13 }
 0x1f8   : > { %v1006_v26 = vmul.f32 0.01, %v946_v21  ;;  %v949_v27 = vadd.f32 %v2239_v24, %v2774_v57  ;;  %v940_v28 = vpop.f32.mrb[23].mxu1 }
 0x1f9   : > { %v1004_v29 = vmul.f32 0.01, %v938_v23  ;;  %v941_v30 = vadd.f32 %v2774_v57, %v940_v28  ;;  %2280 = vmatprep.mubr.bf16.mxu0 %v1056_v25 }
 0x1fa   : > { %v1007_v31 = vmul.f32 0.01, %v949_v27  ;;  %2281 = vmatmul.mubr.bf16.gmra.mrb[48].mxu0 %v1057_v56  ;;  %v1038_v34 = vmax.f32 %v946_v21, %v1006_v26 }
 0x1fb   : > { %v1005_v33 = vmul.f32 0.01, %v941_v30  ;;  %v1036_v36 = vmax.f32 %v938_v23, %v1004_v29 }
 0x1fc   : > { %v1039_v35 = vmax.f32 %v949_v27, %v1007_v31 }
 0x1fd   : > { %v1037_v37 = vmax.f32 %v941_v30, %v1005_v33  ;;  %v2242_v38 = vpop.f32.mrb[24].mxu1 }
 0x1fe   : > { %v962_v39 = vadd.f32 %v2242_v38, %v2774_v57  ;;  %v953_v40 = vpop.f32.mrb[25].mxu1  ;;  %v1059_v41 = vpack.c.bf16 %v1039_v35, %v1038_v34 }
 0x1ff   : > { %v954_v42 = vadd.f32 %v2774_v57, %v953_v40  ;;  %v2243_v43 = vpop.f32.mrb[26].mxu1  ;;  %v1058_v44 = vpack.c.bf16 %v1037_v37, %v1036_v36 }
 0x200   : > { %v1010_v45 = vmul.f32 0.01, %v962_v39  ;;  %v965_v46 = vadd.f32 %v2243_v43, %v2774_v57  ;;  %v956_v47 = vpop.f32.mrb[27].mxu1 }
 0x201   : > { %v1008_v48 = vmul.f32 0.01, %v954_v42  ;;  %v957_v49 = vadd.f32 %v2774_v57, %v956_v47  ;;  %2284 = vmatprep.mubr.bf16.mxu0 %v1058_v44 }
 0x202   : > { %v1011_v50 = vmul.f32 0.01, %v965_v46  ;;  %2285 = vmatmul.mubr.bf16.gmra.mrb[52].mxu0 %v1059_v41  ;;  %v1042_v32 = vmax.f32 %v962_v39, %v1010_v45 }
 0x203   : > { %v1009_v51 = vmul.f32 0.01, %v957_v49  ;;  %v1040_v58 = vmax.f32 %v954_v42, %v1008_v48 }
 0x204   : > { %v1043_v52 = vmax.f32 %v965_v46, %v1011_v50 }
 0x205   : > { %v1041_v53 = vmax.f32 %v957_v49, %v1009_v51  ;;  %v2246_v59 = vpop.f32.mrb[28].mxu1 }
 0x206   : > { %v978_v60 = vadd.f32 %v2246_v59, %v2774_v57  ;;  %v969_v61 = vpop.f32.mrb[29].mxu1  ;;  %v1061_v62 = vpack.c.bf16 %v1043_v52, %v1042_v32 }
 0x207   : > { %v970_v63 = vadd.f32 %v2774_v57, %v969_v61  ;;  %v2247_v0 = vpop.f32.mrb[30].mxu1  ;;  %v1060_v1 = vpack.c.bf16 %v1041_v53, %v1040_v58 }
 0x208   : > { %v1014_v54 = vmul.f32 0.01, %v978_v60  ;;  %v981_v2 = vadd.f32 %v2247_v0, %v2774_v57  ;;  %v972_v3 = vpop.f32.mrb[31].mxu1 }
 0x209   : > { %v1012_v4 = vmul.f32 0.01, %v970_v63  ;;  %v973_v5 = vadd.f32 %v2774_v57, %v972_v3  ;;  %2288 = vmatprep.mubr.bf16.mxu0 %v1060_v1  ;;  %v2441_v57 = vld [vmem:[%s2978_s7 + $0x38] sm:$0xff]  }
 0x20a   : > { %v1015_v6 = vmul.f32 0.01, %v981_v2  ;;  %2289 = vmatmul.mubr.bf16.gmra.mrb[56].mxu0 %v1061_v62  ;;  %v1046_v8 = vmax.f32 %v978_v60, %v1014_v54  ;;  %2310 = vmatprep.subr.bf16.mxu0 %v2441_v57 }
 0x20b   : > { %v1013_v7 = vmul.f32 0.01, %v973_v5  ;;  %v1044_v10 = vmax.f32 %v970_v63, %v1012_v4  ;;  %2351 = vmatprep.subr.bf16.mxu1 %v2441_v57  ;;  %2311 = vmatpush3.bf16.msra.mxu0 %v2441_v57 }
 0x20c   : > { %v1047_v9 = vmax.f32 %v981_v2, %v1015_v6  ;;  %2359 = vmatpush3.bf16.msra.mxu1 %v2441_v57 }
 0x20d   : > { %v1045_v55 = vmax.f32 %v973_v5, %v1013_v7 }
 0x20e   : > { %v1063_v11 = vpack.c.bf16 %v1047_v9, %v1046_v8 }
 0x20f   : > { %v1062_v12 = vpack.c.bf16 %v1045_v55, %v1044_v10 }
 0x211   : > { %2292 = vmatprep.mubr.bf16.mxu0 %v1062_v12 }
 0x212   : > { %2293 = vmatmul.mubr.bf16.gmra.mrb[60].mxu0 %v1063_v11 }
 0x2ad   : > { %v2266_v15 = vpop.f32.mrb[32].mxu0 }
 0x2ae   : > { %v1178_v16 = vadd.f32 %v2266_v15, %v2827_v14  ;;  %v1169_v17 = vpop.f32.mrb[33].mxu0 }
 0x2af   : > { %v1170_v18 = vadd.f32 %v2827_v14, %v1169_v17  ;;  %v2267_v19 = vpop.f32.mrb[34].mxu0 }
 0x2b0   : > { %v1298_v20 = vmul.f32 0.01, %v1178_v16  ;;  %v1181_v21 = vadd.f32 %v2267_v19, %v2827_v14  ;;  %v1172_v22 = vpop.f32.mrb[35].mxu0 }
 0x2b1   : > { %v1296_v56 = vmul.f32 0.01, %v1170_v18  ;;  %v1173_v23 = vadd.f32 %v2827_v14, %v1172_v22 }
 0x2b2   : > { %v1299_v24 = vmul.f32 0.01, %v1181_v21  ;;  %v1330_v26 = vmax.f32 %v1178_v16, %v1298_v20 }
 0x2b3   : > { %v1297_v25 = vmul.f32 0.01, %v1173_v23  ;;  %v1328_v28 = vmax.f32 %v1170_v18, %v1296_v56 }
 0x2b4   : > { %v1331_v27 = vmax.f32 %v1181_v21, %v1299_v24 }
 0x2b5   : > { %v1329_v29 = vmax.f32 %v1173_v23, %v1297_v25  ;;  %v2270_v30 = vpop.f32.mrb[36].mxu0 }
 0x2b6   : > { %v1361_v31 = vpack.c.bf16 %v1331_v27, %v1330_v26  ;;  %v1194_v33 = vadd.f32 %v2270_v30, %v2827_v14  ;;  %v1185_v34 = vpop.f32.mrb[37].mxu0 }
 0x2b7   : > { %v1186_v35 = vadd.f32 %v2827_v14, %v1185_v34  ;;  %v2271_v36 = vpop.f32.mrb[38].mxu0  ;;  %v1360_v37 = vpack.c.bf16 %v1329_v29, %v1328_v28 }
 0x2b8   : > { %v1302_v38 = vmul.f32 0.01, %v1194_v33  ;;  %v1197_v39 = vadd.f32 %v2271_v36, %v2827_v14  ;;  %v1188_v40 = vpop.f32.mrb[39].mxu0 }
 0x2b9   : > { %v1300_v41 = vmul.f32 0.01, %v1186_v35  ;;  %v1189_v42 = vadd.f32 %v2827_v14, %v1188_v40  ;;  %2312 = vmatprep.mubr.bf16.mxu0 %v1360_v37 }
 0x2ba   : > { %v1303_v43 = vmul.f32 0.01, %v1197_v39  ;;  %2313 = vmatmul.mubr.bf16.vlgmr.msra.gmra.mrb[64].mxu0 %v1361_v31  ;;  %v1334_v45 = vmax.f32 %v1194_v33, %v1302_v38 }
 0x2bb   : > { %v1301_v44 = vmul.f32 0.01, %v1189_v42  ;;  %v1332_v47 = vmax.f32 %v1186_v35, %v1300_v41 }
 0x2bc   : > { %v1335_v46 = vmax.f32 %v1197_v39, %v1303_v43 }
 0x2bd   : > { %v1333_v48 = vmax.f32 %v1189_v42, %v1301_v44  ;;  %v2274_v49 = vpop.f32.mrb[40].mxu0 }
 0x2be   : > { %v1363_v50 = vpack.c.bf16 %v1335_v46, %v1334_v45  ;;  %v1210_v51 = vadd.f32 %v2274_v49, %v2827_v14  ;;  %v1201_v32 = vpop.f32.mrb[41].mxu0 }
 0x2bf   : > { %v1202_v52 = vadd.f32 %v2827_v14, %v1201_v32  ;;  %v2275_v58 = vpop.f32.mrb[42].mxu0  ;;  %v1362_v53 = vpack.c.bf16 %v1333_v48, %v1332_v47 }
 0x2c0   : > { %v1306_v59 = vmul.f32 0.01, %v1210_v51  ;;  %v1213_v60 = vadd.f32 %v2275_v58, %v2827_v14  ;;  %v1204_v61 = vpop.f32.mrb[43].mxu0 }
 0x2c1   : > { %v1304_v62 = vmul.f32 0.01, %v1202_v52  ;;  %v1205_v63 = vadd.f32 %v2827_v14, %v1204_v61  ;;  %2316 = vmatprep.mubr.bf16.mxu1 %v1362_v53 }
 0x2c2   : > { %v1307_v0 = vmul.f32 0.01, %v1213_v60  ;;  %2317 = vmatmul.mubr.bf16.vlgmr.msra.gmra.mrb[32].mxu1 %v1363_v50  ;;  %v1338_v54 = vmax.f32 %v1210_v51, %v1306_v59 }
 0x2c3   : > { %v1305_v1 = vmul.f32 0.01, %v1205_v63  ;;  %v1336_v3 = vmax.f32 %v1202_v52, %v1304_v62 }
 0x2c4   : > { %v1339_v2 = vmax.f32 %v1213_v60, %v1307_v0 }
 0x2c5   : > { %v1337_v4 = vmax.f32 %v1205_v63, %v1305_v1  ;;  %v2278_v5 = vpop.f32.mrb[44].mxu0 }
 0x2c6   : > { %v1226_v6 = vadd.f32 %v2278_v5, %v2827_v14  ;;  %v1217_v7 = vpop.f32.mrb[45].mxu0  ;;  %v1365_v8 = vpack.c.bf16 %v1339_v2, %v1338_v54 }
 0x2c7   : > { %v1218_v9 = vadd.f32 %v2827_v14, %v1217_v7  ;;  %v2279_v10 = vpop.f32.mrb[46].mxu0  ;;  %v1364_v55 = vpack.c.bf16 %v1337_v4, %v1336_v3 }
 0x2c8   : > { %v1310_v11 = vmul.f32 0.01, %v1226_v6  ;;  %v1229_v12 = vadd.f32 %v2279_v10, %v2827_v14  ;;  %v1220_v13 = vpop.f32.mrb[47].mxu0 }
 0x2c9   : > { %v1308_v57 = vmul.f32 0.01, %v1218_v9  ;;  %v1221_v15 = vadd.f32 %v2827_v14, %v1220_v13  ;;  %2320 = vmatprep.mubr.bf16.mxu1 %v1364_v55 }
 0x2ca   : > { %v1311_v16 = vmul.f32 0.01, %v1229_v12  ;;  %2321 = vmatmul.mubr.bf16.gmra.mrb[36].mxu1 %v1365_v8  ;;  %v1342_v18 = vmax.f32 %v1226_v6, %v1310_v11 }
 0x2cb   : > { %v1309_v17 = vmul.f32 0.01, %v1221_v15  ;;  %v1340_v20 = vmax.f32 %v1218_v9, %v1308_v57 }
 0x2cc   : > { %v1343_v19 = vmax.f32 %v1229_v12, %v1311_v16 }
 0x2cd   : > { %v1341_v21 = vmax.f32 %v1221_v15, %v1309_v17  ;;  %v2282_v22 = vpop.f32.mrb[48].mxu0 }
 0x2ce   : > { %v1242_v56 = vadd.f32 %v2282_v22, %v2827_v14  ;;  %v1233_v23 = vpop.f32.mrb[49].mxu0  ;;  %v1367_v24 = vpack.c.bf16 %v1343_v19, %v1342_v18 }
 0x2cf   : > { %v1234_v25 = vadd.f32 %v2827_v14, %v1233_v23  ;;  %v2283_v26 = vpop.f32.mrb[50].mxu0  ;;  %v1366_v27 = vpack.c.bf16 %v1341_v21, %v1340_v20 }
 0x2d0   : > { %v1314_v28 = vmul.f32 0.01, %v1242_v56  ;;  %v1245_v29 = vadd.f32 %v2283_v26, %v2827_v14  ;;  %v1236_v30 = vpop.f32.mrb[51].mxu0 }
 0x2d1   : > { %v1312_v31 = vmul.f32 0.01, %v1234_v25  ;;  %v1237_v33 = vadd.f32 %v2827_v14, %v1236_v30  ;;  %2324 = vmatprep.mubr.bf16.mxu1 %v1366_v27 }
 0x2d2   : > { %v1315_v34 = vmul.f32 0.01, %v1245_v29  ;;  %2325 = vmatmul.mubr.bf16.gmra.mrb[40].mxu1 %v1367_v24  ;;  %v1346_v36 = vmax.f32 %v1242_v56, %v1314_v28 }
 0x2d3   : > { %v1313_v35 = vmul.f32 0.01, %v1237_v33  ;;  %v1344_v38 = vmax.f32 %v1234_v25, %v1312_v31 }
 0x2d4   : > { %v1347_v37 = vmax.f32 %v1245_v29, %v1315_v34  ;;  %v2865_v34 = vld [vmem:[%s2979_s8] ss:$0 sm:$0xff] }
 0x2d5   : > { %v1345_v39 = vmax.f32 %v1237_v33, %v1313_v35  ;;  %v2286_v40 = vpop.f32.mrb[52].mxu0 }
 0x2d6   : > { %v1258_v41 = vadd.f32 %v2286_v40, %v2827_v14  ;;  %v1249_v42 = vpop.f32.mrb[53].mxu0  ;;  %v1369_v43 = vpack.c.bf16 %v1347_v37, %v1346_v36 }
 0x2d7   : > { %v1250_v44 = vadd.f32 %v2827_v14, %v1249_v42  ;;  %v2287_v45 = vpop.f32.mrb[54].mxu0  ;;  %v1368_v46 = vpack.c.bf16 %v1345_v39, %v1344_v38 }
 0x2d8   : > { %v1318_v47 = vmul.f32 0.01, %v1258_v41  ;;  %v1261_v48 = vadd.f32 %v2287_v45, %v2827_v14  ;;  %v1252_v49 = vpop.f32.mrb[55].mxu0 }
 0x2d9   : > { %v1316_v50 = vmul.f32 0.01, %v1250_v44  ;;  %v1253_v51 = vadd.f32 %v2827_v14, %v1252_v49  ;;  %2328 = vmatprep.mubr.bf16.mxu1 %v1368_v46 }
 0x2da   : > { %v1319_v32 = vmul.f32 0.01, %v1261_v48  ;;  %2329 = vmatmul.mubr.bf16.gmra.mrb[44].mxu1 %v1369_v43  ;;  %v1350_v58 = vmax.f32 %v1258_v41, %v1318_v47 }
 0x2db   : > { %v1317_v52 = vmul.f32 0.01, %v1253_v51  ;;  %v1348_v59 = vmax.f32 %v1250_v44, %v1316_v50 }
 0x2dc   : > { %v1351_v53 = vmax.f32 %v1261_v48, %v1319_v32 }
 0x2dd   : > { %v1349_v60 = vmax.f32 %v1253_v51, %v1317_v52  ;;  %v2290_v61 = vpop.f32.mrb[56].mxu0 }
 0x2de   : > { %v1274_v62 = vadd.f32 %v2290_v61, %v2827_v14  ;;  %v1265_v63 = vpop.f32.mrb[57].mxu0  ;;  %v1371_v0 = vpack.c.bf16 %v1351_v53, %v1350_v58 }
 0x2df   : > { %v1266_v1 = vadd.f32 %v2827_v14, %v1265_v63  ;;  %v2291_v54 = vpop.f32.mrb[58].mxu0  ;;  %v1370_v2 = vpack.c.bf16 %v1349_v60, %v1348_v59 }
 0x2e0   : > { %v1322_v3 = vmul.f32 0.01, %v1274_v62  ;;  %v1277_v4 = vadd.f32 %v2291_v54, %v2827_v14  ;;  %v1268_v5 = vpop.f32.mrb[59].mxu0 }
 0x2e1   : > { %v1320_v6 = vmul.f32 0.01, %v1266_v1  ;;  %v1269_v7 = vadd.f32 %v2827_v14, %v1268_v5  ;;  %2332 = vmatprep.mubr.bf16.mxu1 %v1370_v2 }
 0x2e2   : > { %v1323_v8 = vmul.f32 0.01, %v1277_v4  ;;  %2333 = vmatmul.mubr.bf16.gmra.mrb[48].mxu1 %v1371_v0  ;;  %v1354_v10 = vmax.f32 %v1274_v62, %v1322_v3 }
 0x2e3   : > { %v1321_v9 = vmul.f32 0.01, %v1269_v7  ;;  %v1352_v11 = vmax.f32 %v1266_v1, %v1320_v6 }
 0x2e4   : > { %v1355_v55 = vmax.f32 %v1277_v4, %v1323_v8 }
 0x2e5   : > { %v1353_v12 = vmax.f32 %v1269_v7, %v1321_v9  ;;  %v2294_v13 = vpop.f32.mrb[60].mxu0 }
 0x2e6   : > { %v1290_v57 = vadd.f32 %v2294_v13, %v2827_v14  ;;  %v1281_v15 = vpop.f32.mrb[61].mxu0  ;;  %v1373_v16 = vpack.c.bf16 %v1355_v55, %v1354_v10 }
 0x2e7   : > { %v1282_v17 = vadd.f32 %v2827_v14, %v1281_v15  ;;  %v2295_v18 = vpop.f32.mrb[62].mxu0  ;;  %v1372_v19 = vpack.c.bf16 %v1353_v12, %v1352_v11 }
 0x2e8   : > { %v1326_v20 = vmul.f32 0.01, %v1290_v57  ;;  %v1293_v21 = vadd.f32 %v2295_v18, %v2827_v14  ;;  %v1284_v22 = vpop.f32.mrb[63].mxu0 }
 0x2e9   : > { %v1324_v56 = vmul.f32 0.01, %v1282_v17  ;;  %v1285_v23 = vadd.f32 %v2827_v14, %v1284_v22  ;;  %2336 = vmatprep.mubr.bf16.mxu1 %v1372_v19 }
 0x2ea   : > { %v1327_v24 = vmul.f32 0.01, %v1293_v21  ;;  %2337 = vmatmul.mubr.bf16.gmra.mrb[52].mxu1 %v1373_v16  ;;  %v1358_v26 = vmax.f32 %v1290_v57, %v1326_v20 }
 0x2eb   : > { %v1325_v25 = vmul.f32 0.01, %v1285_v23  ;;  %v1356_v28 = vmax.f32 %v1282_v17, %v1324_v56 }
 0x2ec   : > { %v1359_v27 = vmax.f32 %v1293_v21, %v1327_v24 }
 0x2ed   : > { %v1357_v29 = vmax.f32 %v1285_v23, %v1325_v25 }
 0x2ee   : > { %v1375_v30 = vpack.c.bf16 %v1359_v27, %v1358_v26 }
 0x2ef   : > { %v1374_v31 = vpack.c.bf16 %v1357_v29, %v1356_v28 }
 0x2f1   : > { %2340 = vmatprep.mubr.bf16.mxu1 %v1374_v31 }
 0x2f2   : > { %2341 = vmatmul.mubr.bf16.gmra.mrb[56].mxu1 %v1375_v30 }
 0x38d   : > { %v2314_v33 = vpop.f32.mrb[64].mxu0 }
 0x38e   : > { %v1481_v14 = vpop.f32.mrb[65].mxu0  ;;  %v1490_v36 = vadd.f32 %v2314_v33, %v2865_v34 }
 0x38f   : > { %v2315_v35 = vpop.f32.mrb[66].mxu0  ;;  %v1482_v39 = vadd.f32 %v2865_v34, %v1481_v14 }
 0x390   : > { %v1493_v37 = vadd.f32 %v2315_v35, %v2865_v34  ;;  %v1484_v38 = vpop.f32.mrb[67].mxu0 }
 0x391   : > { %v1485_v40 = vadd.f32 %v2865_v34, %v1484_v38 }
 0x392   : > { %v1990_v41 = vpack.c.bf16 %v1493_v37, %v1490_v36 }
 0x393   : > { %v1985_v42 = vpack.c.bf16 %v1485_v40, %v1482_v39 }
 0x394   : > { %2062 = vst [vmem:[%s2873_s26 + $0x8] sm:$0xff] %v1990_v41  }
 0x395   : > { %1986 = vst [vmem:[%s2873_s26] sm:$0xff] %v1985_v42   ;;  %v2318_v43 = vpop.f32.mrb[32].mxu1 }
 0x396   : > { %v1497_v44 = vpop.f32.mrb[33].mxu1  ;;  %v1506_v46 = vadd.f32 %v2318_v43, %v2865_v34 }
 0x397   : > { %v2319_v45 = vpop.f32.mrb[34].mxu1  ;;  %v1498_v49 = vadd.f32 %v2865_v34, %v1497_v44 }
 0x398   : > { %v1509_v47 = vadd.f32 %v2319_v45, %v2865_v34  ;;  %v1500_v48 = vpop.f32.mrb[35].mxu1 }
 0x399   : > { %v1501_v50 = vadd.f32 %v2865_v34, %v1500_v48 }
 0x39a   : > { %v2000_v51 = vpack.c.bf16 %v1509_v47, %v1506_v46 }
 0x39b   : > { %v1995_v32 = vpack.c.bf16 %v1501_v50, %v1498_v49 }
 0x39c   : > { %2064 = vst [vmem:[%s2873_s26 + $0x18] sm:$0xff] %v2000_v51  }
 0x39d   : > { %2063 = vst [vmem:[%s2873_s26 + $0x10] sm:$0xff] %v1995_v32   ;;  %v2322_v52 = vpop.f32.mrb[36].mxu1 }
 0x39e   : > { %v1513_v58 = vpop.f32.mrb[37].mxu1  ;;  %v1522_v59 = vadd.f32 %v2322_v52, %v2865_v34 }
 0x39f   : > { %v2323_v53 = vpop.f32.mrb[38].mxu1  ;;  %v1514_v62 = vadd.f32 %v2865_v34, %v1513_v58 }
 0x3a0   : > { %v1525_v60 = vadd.f32 %v2323_v53, %v2865_v34  ;;  %v1516_v61 = vpop.f32.mrb[39].mxu1 }
 0x3a1   : > { %v1517_v63 = vadd.f32 %v2865_v34, %v1516_v61 }
 0x3a2   : > { %v2010_v0 = vpack.c.bf16 %v1525_v60, %v1522_v59 }
 0x3a3   : > { %v2005_v1 = vpack.c.bf16 %v1517_v63, %v1514_v62 }
 0x3a4   : > { %2066 = vst [vmem:[%s2873_s26 + $0x28] sm:$0xff] %v2010_v0  }
 0x3a5   : > { %2065 = vst [vmem:[%s2873_s26 + $0x20] sm:$0xff] %v2005_v1   ;;  %v2326_v54 = vpop.f32.mrb[40].mxu1 }
 0x3a6   : > { %v1529_v2 = vpop.f32.mrb[41].mxu1  ;;  %v1538_v4 = vadd.f32 %v2326_v54, %v2865_v34 }
 0x3a7   : > { %v2327_v3 = vpop.f32.mrb[42].mxu1  ;;  %v1530_v7 = vadd.f32 %v2865_v34, %v1529_v2 }
 0x3a8   : > { %v1541_v5 = vadd.f32 %v2327_v3, %v2865_v34  ;;  %v1532_v6 = vpop.f32.mrb[43].mxu1 }
 0x3a9   : > { %v1533_v8 = vadd.f32 %v2865_v34, %v1532_v6 }
 0x3aa   : > { %v2020_v9 = vpack.c.bf16 %v1541_v5, %v1538_v4 }
 0x3ab   : > { %v2015_v10 = vpack.c.bf16 %v1533_v8, %v1530_v7 }
 0x3ac   : > { %2068 = vst [vmem:[%s2873_s26 + $0x38] sm:$0xff] %v2020_v9  }
 0x3ad   : > { %2067 = vst [vmem:[%s2873_s26 + $0x30] sm:$0xff] %v2015_v10   ;;  %v2330_v55 = vpop.f32.mrb[44].mxu1 }
 0x3ae   : > { %v1545_v11 = vpop.f32.mrb[45].mxu1  ;;  %v1554_v13 = vadd.f32 %v2330_v55, %v2865_v34 }
 0x3af   : > { %v2331_v12 = vpop.f32.mrb[46].mxu1  ;;  %v1546_v16 = vadd.f32 %v2865_v34, %v1545_v11 }
 0x3b0   : > { %v1557_v57 = vadd.f32 %v2331_v12, %v2865_v34  ;;  %v1548_v15 = vpop.f32.mrb[47].mxu1 }
 0x3b1   : > { %v1549_v17 = vadd.f32 %v2865_v34, %v1548_v15 }
 0x3b2   : > { %v2030_v18 = vpack.c.bf16 %v1557_v57, %v1554_v13 }
 0x3b3   : > { %v2025_v19 = vpack.c.bf16 %v1549_v17, %v1546_v16 }
 0x3b4   : > { %2070 = vst [vmem:[%s2873_s26 + $0x48] sm:$0xff] %v2030_v18  }
 0x3b5   : > { %2069 = vst [vmem:[%s2873_s26 + $0x40] sm:$0xff] %v2025_v19   ;;  %v2334_v20 = vpop.f32.mrb[48].mxu1 }
 0x3b6   : > { %v1561_v21 = vpop.f32.mrb[49].mxu1  ;;  %v1570_v56 = vadd.f32 %v2334_v20, %v2865_v34 }
 0x3b7   : > { %v2335_v22 = vpop.f32.mrb[50].mxu1  ;;  %v1562_v25 = vadd.f32 %v2865_v34, %v1561_v21 }
 0x3b8   : > { %v1573_v23 = vadd.f32 %v2335_v22, %v2865_v34  ;;  %v1564_v24 = vpop.f32.mrb[51].mxu1 }
 0x3b9   : > { %v1565_v26 = vadd.f32 %v2865_v34, %v1564_v24 }
 0x3ba   : > { %v2040_v27 = vpack.c.bf16 %v1573_v23, %v1570_v56 }
 0x3bb   : > { %v2035_v28 = vpack.c.bf16 %v1565_v26, %v1562_v25 }
 0x3bc   : > { %2072 = vst [vmem:[%s2873_s26 + $0x58] sm:$0xff] %v2040_v27  }
 0x3bd   : > { %2071 = vst [vmem:[%s2873_s26 + $0x50] sm:$0xff] %v2035_v28   ;;  %v2338_v29 = vpop.f32.mrb[52].mxu1 }
 0x3be   : > { %v1577_v30 = vpop.f32.mrb[53].mxu1  ;;  %v1586_v33 = vadd.f32 %v2338_v29, %v2865_v34 }
 0x3bf   : > { %v2339_v31 = vpop.f32.mrb[54].mxu1  ;;  %v1578_v36 = vadd.f32 %v2865_v34, %v1577_v30 }
 0x3c0   : > { %v1589_v14 = vadd.f32 %v2339_v31, %v2865_v34  ;;  %v1580_v35 = vpop.f32.mrb[55].mxu1 }
 0x3c1   : > { %v1581_v37 = vadd.f32 %v2865_v34, %v1580_v35 }
 0x3c2   : > { %v2050_v38 = vpack.c.bf16 %v1589_v14, %v1586_v33 }
 0x3c3   : > { %v2045_v39 = vpack.c.bf16 %v1581_v37, %v1578_v36 }
 0x3c4   : > { %2074 = vst [vmem:[%s2873_s26 + $0x68] sm:$0xff] %v2050_v38  }
 0x3c5   : > { %2073 = vst [vmem:[%s2873_s26 + $0x60] sm:$0xff] %v2045_v39   ;;  %v2342_v40 = vpop.f32.mrb[56].mxu1 }
 0x3c6   : > { %v1593_v41 = vpop.f32.mrb[57].mxu1  ;;  %v1602_v43 = vadd.f32 %v2342_v40, %v2865_v34 }
 0x3c7   : > { %v2343_v42 = vpop.f32.mrb[58].mxu1  ;;  %v1594_v46 = vadd.f32 %v2865_v34, %v1593_v41 }
 0x3c8   : > { %v1605_v44 = vadd.f32 %v2343_v42, %v2865_v34  ;;  %v1596_v45 = vpop.f32.mrb[59].mxu1 }
 0x3c9   : > { %v1597_v47 = vadd.f32 %v2865_v34, %v1596_v45 }
 0x3ca   : > { %v2060_v48 = vpack.c.bf16 %v1605_v44, %v1602_v43 }
 0x3cb   : > { %v2055_v49 = vpack.c.bf16 %v1597_v47, %v1594_v46 }
 0x3cc   : > { %2076 = vst [vmem:[%s2873_s26 + $0x78] sm:$0xff] %v2060_v48  }
 0x3cd   : > { %2075 = vst [vmem:[%s2873_s26 + $0x70] sm:$0xff] %v2055_v49  }
 0x3ce   : > { %2455 = shalt.err (!%p2452_p3)
}
 0x3cf   : > { %s2456_s22 = scalar_lea.hbm %s2922_s17, 2048  ;;  %s2460_s27 = scalar_lea.hbm %s2980_s9, 4096 }
 0x3d0   : > { %p2457_p4 = scmp.ne.s32.totalorder %s2922_s17, %s2456_s22  ;;  %p2461_p9 = scmp.lt.u32.totalorder %s2922_s17, %s2980_s9 }
 0x3d1   : > { %p2462_p10 = scmp.lt.u32.totalorder %s2460_s27, %s2456_s22  ;;  %p2464_p12 = scmp.lt.u32.totalorder %s2456_s22, %s2922_s17 }
 0x3d2   : > { %p2458_p7 = pnand %p2457_p4, %p2597_p5 }
 0x3d3   : > { %p2463_p11 = por %p2462_p10, %p2461_p9 }
 0x3d4   : > { %p2459_p8 = pneg %p2458_p7 }
 0x3d5   : > { %p2465_p13 = por %p2464_p12, %p2463_p11 }
 0x3d7   : > { %p2466_p0 = pnand %p2465_p13, %p2459_p8 }
 0x3d9   : > { %2469 = shalt.err (!%p2466_p0)
}
 0x3da   : > { %s2507_s16 = smov 64   ;;  %s2508_s21 = smov 4  }
 0x3db   : > { %2360 = dma.vmem_to_hbm [thread:$0]  (%p2597_p5), %s2924_s28, 2048, %s2922_s17, %s2930_s13, %s2507_s16, %s2507_s16, %s2508_s21  }
 0x3dc PF: > { %p2366_p1 = scmp.ge.s32.totalorder %s2504_s12, 2  ;;  %s1797_s23 = sand.u32 1, %s2492_s30  }
 0x3dd   : > { %s1798_s24 = scalar_lea.sflag [#allocation3], %s1797_s23 }
 0x3de   : > { %p2363_p2 = pnand %p2366_p1, %p2601_p6 }
 0x3e0   : > { %2487 = dma.done.wait (!%p2363_p2), %s1798_s24, 2048  }
 0x3e1   : > { %2489 = vsyncadd (!%p2363_p2), %s1798_s24, 4294965248  ;;  %p19_p3 = scmp.ge.s32.totalorder %s2584_s15, 4   ;;  %s2983_s30 = smov %s2496_s10 }
 0x3e2   : > { %s2984_s10 = smov %s2500_s11  ;;  %s2985_s11 = smov %s2595_s18 }
 0x3e3   : > { %s2986_s12 = smov %s2584_s15  ;;  %21 = sbr.rel (!%p19_p3) target bundleno = 3 (0x3), region = 91 }
 0x3ea   :  { %1803 = vsyncpa [#allocation3], 1 }
 0x3eb   :  { %1805 = vsyncpa [#allocation3 + $0x1], 1 }

// kernel: tpu_custom_call.1
= control target key start
LH: loop header
LB: loop body
LE: loop exit
PB: predicated region body
PF: predicated region fallthrough
CT: control target
= control target key end

     0   :  { %14 = vsyncpa [#allocation3], 0  ;;  %s2971_s0 = inlined_call_operand.vmem [shape: bf16[512,16], index: 0, kind: input, shape index: {}]   ;;  %s2972_s1 = inlined_call_operand.vmem [shape: bf16[16,128], index: 1, kind: input, shape index: {}]   ;;  %s2973_s2 = inlined_call_operand.vmem [shape: f32[1,128], index: 2, kind: input, shape index: {}]   ;;  %s2974_s3 = inlined_call_operand.vmem [shape: bf16[128,128], index: 3, kind: input, shape index: {}]   ;;  %s2975_s4 = inlined_call_operand.vmem [shape: f32[1,128], index: 4, kind: input, shape index: {}]   ;;  %s2976_s5 = inlined_call_operand.vmem [shape: bf16[128,128], index: 5, kind: input, shape index: {}]   ;;  %s2977_s6 = inlined_call_operand.vmem [shape: f32[1,128], index: 6, kind: input, shape index: {}]   ;;  %s2978_s7 = inlined_call_operand.vmem [shape: bf16[128,128], index: 7, kind: input, shape index: {}]   ;;  %s2979_s8 = inlined_call_operand.vmem [shape: f32[1,128], index: 8, kind: input, shape index: {}]   ;;  %s2980_s9 = inlined_call_operand.hbm [shape: bf16[512,128], index: 9, kind: output, shape index: {}]  }
   0x1   :  { %16 = vsyncpa [#allocation3 + $0x1], 0  ;;  %s2559_s30 = smov 0   ;;  %s2561_s10 = smov 0  }
   0x2   :  { %s2563_s11 = smov 0   ;;  %s2565_s12 = smov 0  }
   0x3 LB: > { %s2580_s13 = sadd.s32 4294967295, %s2504_s12   ;;  %s1844_s14 = sadd.s32 4294967294, %s2504_s12   ;;  %s2504_s12 = sphi %s2565_s12, %s2986_s12   ;;  %s2500_s11 = sphi %s2563_s11, %s2985_s11   ;;  %s2496_s10 = sphi %s2561_s10, %s2984_s10   ;;  %s2492_s30 = sphi %s2559_s30, %s2983_s30  }
   0x4   : > { %s2584_s15 = sadd.s32 1, %s2504_s12   ;;  %s223_s16 = sadd.s32 1, %s2500_s11 }
   0x5   : > { %s220_s17 = ssub.s32 %s2504_s12, %s2584_s15  ;;  %p233_p0 = scmp.ne.s32.totalorder %s2500_s11, %s2496_s10 }
   0x6   : > { %p221_p1 = scmp.eq.s32.totalorder %s220_s17, 0  ;;  %p234_p2 = scmp.eq.s32.totalorder %s2580_s13, 1 }
   0x7   : > { %p239_p3 = scmp.ne.s32.totalorder %s2496_s10, %s2492_s30  ;;  %p240_p4 = scmp.eq.s32.totalorder %s1844_s14, 1 }
   0x8   : > { %s2595_s18 = scalar_select %p221_p1, %s2500_s11, %s223_s16  }
   0x9   : > { %p2597_p5 = por %p234_p2, %p233_p0  ;;  %p2601_p6 = por %p240_p4, %p239_p3 }
   0xa   : > { %p1847_p7 = scmp.ge.s32.totalorder %s2504_s12, 1  ;;  %p291_p8 = scmp.lt.s32.totalorder %s2504_s12, 3 }
   0xc   : > { %p292_p9 = pnand %p1847_p7, %p291_p8 }
   0xd   : > { %v2401_v0 = vld [vmem:[%s2972_s1] sm:$0xff] (!%p292_p9)   ;;  %s1849_s23 = sshll.u32 (!%p292_p9), %s2580_s13, 5  ;;  %v2419_v2 = vld [vmem:[%s2974_s3 + $0x8] sm:$0xff] (!%p292_p9)   ;;  %vm462_vm0 = vcmask (!%p292_p9), 130048   ;;  %v2420_v3 = vld [vmem:[%s2974_s3 + $0x10] sm:$0xff] (!%p292_p9)   ;;  %s324_s22 = sand.u32 (!%p292_p9), 1, %s2496_s10  }
   0xe   : > { %295 = sbr.rel (%p292_p9) target bundleno = 988 (0x3dc), region = 56  ;;  %p328_p10 = scmp.lt.s32.totalorder (!%p292_p9), %s1849_s23, 63  ;;  %2166 = vmatprep.subr.bf16.mxu0 (!%p292_p9), %v2401_v0  ;;  %v2418_v1 = vld [vmem:[%s2974_s3] sm:$0xff] (!%p292_p9)   ;;  %v2421_v7 = vld [vmem:[%s2974_s3 + $0x18] sm:$0xff] (!%p292_p9)   ;;  %v2423_v22 = vld [vmem:[%s2974_s3 + $0x28] sm:$0xff] (!%p292_p9)  }
   0xf   : > { %2167 = vmatpush3.bf16.msra.mxu0 (!%p292_p9), %v2401_v0  ;;  %2200 = vmatprep.subr.bf16.mxu1 (!%p292_p9), %v2418_v1  ;;  %v2422_v8 = vld [vmem:[%s2974_s3 + $0x20] sm:$0xff] (!%p292_p9)   ;;  %v2424_v23 = vld [vmem:[%s2974_s3 + $0x30] sm:$0xff] (!%p292_p9)   ;;  %v2425_v24 = vld [vmem:[%s2974_s3 + $0x38] sm:$0xff] (!%p292_p9)   ;;  %s1848_s25 = sshll.u32 (!%p292_p9), %s324_s22, 7  ;;  %s1981_s27 = sshll.u32 (!%p292_p9), %s2580_s13, 11 }
  0x10   : > { %2201 = vmatpush3.bf16.msra.mxu1 (!%p292_p9), %v2418_v1  ;;  %v2426_v25 = vld [vmem:[%s2976_s5] sm:$0xff] (!%p292_p9)   ;;  %v2427_v26 = vld [vmem:[%s2976_s5 + $0x8] sm:$0xff] (!%p292_p9)   ;;  %v2428_v27 = vld [vmem:[%s2976_s5 + $0x10] sm:$0xff] (!%p292_p9)   ;;  %s2873_s26 = scalar_lea.vmem (!%p292_p9), [#allocation2], %s1848_s25  ;;  %s2922_s17 = scalar_lea.hbm (!%p292_p9), %s2980_s9, %s1981_s27 }
  0x11   : > { %2202 = vmatprep.subr.bf16.mxu1 (!%p292_p9), %v2419_v2  ;;  %2248 = vmatprep.subr.bf16.mxu0 (!%p292_p9), %v2426_v25  ;;  %v2429_v28 = vld [vmem:[%s2976_s5 + $0x18] sm:$0xff] (!%p292_p9)   ;;  %v2430_v29 = vld [vmem:[%s2976_s5 + $0x20] sm:$0xff] (!%p292_p9)   ;;  %v2431_v30 = vld [vmem:[%s2976_s5 + $0x28] sm:$0xff] (!%p292_p9)   ;;  %s2930_s13 = scalar_lea.sflag (!%p292_p9), [#allocation3], %s324_s22  ;;  %s2506_s21 = smov (!%p292_p9), [#allocation2]  }
  0x12   : > { %v2432_v31 = vld [vmem:[%s2976_s5 + $0x30] sm:$0xff] (!%p292_p9)   ;;  %v2696_v32 = vld [vmem:[%s2973_s2] ss:$0 sm:$0xff] (!%p292_p9) }
  0x14   : > { %2203 = vmatpush3.bf16.msra.mxu1 (!%p292_p9), %v2419_v2 }
  0x15   : > { %s2988_s23 = smov (!%p328_p10, %s1849_s23), 63  ;;  %2204 = vmatprep.subr.bf16.mxu1 %v2420_v3 }
  0x16   : > { %s1850_s28 = sshll.u32 %s2988_s23, 2  ;;  %s2446_s23 = sshll.u32 %s2506_s21, 4  ;;  %s2447_s23 = int_to_ptr.vmem [resolvable:$false] %s2446_s23 }
  0x17   : > { %s2620_s16 = scalar_lea.vmem %s2971_s0, %s1850_s28  ;;  %s1782_s28 = sshll.u32 %s2873_s26, 4  ;;  %s2924_s28 = int_to_ptr.vmem [resolvable:$true] %s1782_s28 }
  0x18   : > { %v2402_v4 = vld [vmem:[%s2620_s16] sm:$0xff]   ;;  %v2403_v5 = vld [vmem:[%s2620_s16 + $0x8] sm:$0xff]   ;;  %v2404_v6 = vld [vmem:[%s2620_s16 + $0x10] sm:$0xff]   ;;  %2205 = vmatpush3.bf16.msra.mxu1 %v2420_v3  ;;  %s2448_s24 = scalar_lea.vmem %s2447_s23, 4096  ;;  %p2449_p0 = scmp.lt.s32.totalorder %s2924_s28, %s2447_s23 }
  0x19   : > { %2168 = vmatprep.mubr.msk.bf16.mxu0 %vm462_vm0, %v2402_v4  ;;  %v2405_v9 = vld [vmem:[%s2620_s16 + $0x18] sm:$0xff]   ;;  %2206 = vmatprep.subr.bf16.mxu1 %v2421_v7  ;;  %v2406_v10 = vld [vmem:[%s2620_s16 + $0x20] sm:$0xff]   ;;  %v2407_v11 = vld [vmem:[%s2620_s16 + $0x28] sm:$0xff]  }
  0x1a   : > { %2169 = vmatmul.mubr.msk.bf16.vlgmr.msra.gmra.mrb[0].mxu0 %vm462_vm0, %v2403_v5  ;;  %v2408_v12 = vld [vmem:[%s2620_s16 + $0x30] sm:$0xff]   ;;  %v2409_v13 = vld [vmem:[%s2620_s16 + $0x38] sm:$0xff]   ;;  %v2410_v14 = vld [vmem:[%s2620_s16 + $0x40] sm:$0xff]  }
  0x1b   : > { %2172 = vmatprep.mubr.msk.bf16.mxu0 %vm462_vm0, %v2404_v6  ;;  %v2411_v15 = vld [vmem:[%s2620_s16 + $0x48] sm:$0xff]   ;;  %v2412_v16 = vld [vmem:[%s2620_s16 + $0x50] sm:$0xff]   ;;  %v2413_v17 = vld [vmem:[%s2620_s16 + $0x58] sm:$0xff]   ;;  %2249 = vmatpush3.bf16.msra.mxu0 %v2426_v25 }
  0x1c   : > { %2207 = vmatpush3.bf16.msra.mxu1 %v2421_v7  ;;  %v2414_v18 = vld [vmem:[%s2620_s16 + $0x60] sm:$0xff]   ;;  %v2415_v19 = vld [vmem:[%s2620_s16 + $0x68] sm:$0xff]   ;;  %v2416_v20 = vld [vmem:[%s2620_s16 + $0x70] sm:$0xff]   ;;  %2250 = vmatprep.subr.bf16.mxu0 %v2427_v26 }
  0x1d   : > { %2208 = vmatprep.subr.bf16.mxu1 %v2422_v8  ;;  %v2417_v21 = vld [vmem:[%s2620_s16 + $0x78] sm:$0xff]   ;;  %s2442_s16 = scalar_lea.vmem %s2924_s28, 2048 }
  0x1e   : > { %p2443_p11 = scmp.ne.s32.totalorder %s2924_s28, %s2442_s16  ;;  %p2450_p1 = scmp.lt.s32.totalorder %s2448_s24, %s2442_s16 }
  0x1f   : > { %2251 = vmatpush3.bf16.msra.mxu0 %v2427_v26 }
  0x20   : > { %2209 = vmatpush3.bf16.msra.mxu1 %v2422_v8  ;;  %2252 = vmatprep.subr.bf16.mxu0 %v2428_v27  ;;  %p2444_p12 = pnand %p2443_p11, %p2597_p5  ;;  %p2451_p2 = por %p2450_p1, %p2449_p0 }
  0x21   : > { %2210 = vmatprep.subr.bf16.mxu1 %v2423_v22 }
  0x22   : > { %2173 = vmatmul.mubr.msk.bf16.gmra.mrb[4].mxu0 %vm462_vm0, %v2405_v9  ;;  %p2445_p13 = pneg %p2444_p12 }
  0x23   : > { %2176 = vmatprep.mubr.msk.bf16.mxu0 %vm462_vm0, %v2406_v10  ;;  %2253 = vmatpush3.bf16.msra.mxu0 %v2428_v27 }
  0x24   : > { %2211 = vmatpush3.bf16.msra.mxu1 %v2423_v22  ;;  %2254 = vmatprep.subr.bf16.mxu0 %v2429_v28  ;;  %p2452_p3 = pnand %p2451_p2, %p2445_p13 }
  0x25   : > { %2212 = vmatprep.subr.bf16.mxu1 %v2424_v23 }
  0x27   : > { %2255 = vmatpush3.bf16.msra.mxu0 %v2429_v28 }
  0x28   : > { %2213 = vmatpush3.bf16.msra.mxu1 %v2424_v23  ;;  %2256 = vmatprep.subr.bf16.mxu0 %v2430_v29 }
  0x29   : > { %2214 = vmatprep.subr.bf16.mxu1 %v2425_v24 }
  0x2a   : > { %2177 = vmatmul.mubr.msk.bf16.gmra.mrb[8].mxu0 %vm462_vm0, %v2407_v11 }
  0x2b   : > { %2180 = vmatprep.mubr.msk.bf16.mxu0 %vm462_vm0, %v2408_v12  ;;  %2257 = vmatpush3.bf16.msra.mxu0 %v2430_v29 }
  0x2c   : > { %2215 = vmatpush3.bf16.msra.mxu1 %v2425_v24  ;;  %2258 = vmatprep.subr.bf16.mxu0 %v2431_v30 }
  0x2f   : > { %2259 = vmatpush3.bf16.msra.mxu0 %v2431_v30 }
  0x30   : > { %2260 = vmatprep.subr.bf16.mxu0 %v2432_v31 }
  0x32   : > { %2181 = vmatmul.mubr.msk.bf16.gmra.mrb[12].mxu0 %vm462_vm0, %v2409_v13 }
  0x33   : > { %2184 = vmatprep.mubr.msk.bf16.mxu0 %vm462_vm0, %v2410_v14  ;;  %2261 = vmatpush3.bf16.msra.mxu0 %v2432_v31 }
  0x3a   : > { %2185 = vmatmul.mubr.msk.bf16.gmra.mrb[16].mxu0 %vm462_vm0, %v2411_v15 }
  0x3b   : > { %2188 = vmatprep.mubr.msk.bf16.mxu0 %vm462_vm0, %v2412_v16 }
  0x42   : > { %2189 = vmatmul.mubr.msk.bf16.gmra.mrb[20].mxu0 %vm462_vm0, %v2413_v17 }
  0x43   : > { %2192 = vmatprep.mubr.msk.bf16.mxu0 %vm462_vm0, %v2414_v18 }
  0x4a   : > { %2193 = vmatmul.mubr.msk.bf16.gmra.mrb[24].mxu0 %vm462_vm0, %v2415_v19 }
  0x4b   : > { %2196 = vmatprep.mubr.msk.bf16.mxu0 %vm462_vm0, %v2416_v20 }
  0x52   : > { %2197 = vmatmul.mubr.msk.bf16.gmra.mrb[28].mxu0 %vm462_vm0, %v2417_v21 }
  0xed   : > { %v2170_v33 = vpop.f32.mrb[0].mxu0 }
  0xee   : > { %v554_v34 = vadd.f32 %v2170_v33, %v2696_v32  ;;  %v545_v35 = vpop.f32.mrb[1].mxu0 }
  0xef   : > { %v546_v36 = vadd.f32 %v2696_v32, %v545_v35  ;;  %v2171_v37 = vpop.f32.mrb[2].mxu0 }
  0xf0   : > { %v674_v38 = vmul.f32 0.01, %v554_v34  ;;  %v557_v39 = vadd.f32 %v2171_v37, %v2696_v32  ;;  %v548_v40 = vpop.f32.mrb[3].mxu0 }
  0xf1   : > { %v672_v41 = vmul.f32 0.01, %v546_v36  ;;  %v549_v42 = vadd.f32 %v2696_v32, %v548_v40 }
  0xf2   : > { %v675_v43 = vmul.f32 0.01, %v557_v39  ;;  %v706_v45 = vmax.f32 %v554_v34, %v674_v38 }
  0xf3   : > { %v673_v44 = vmul.f32 0.01, %v549_v42  ;;  %v704_v48 = vmax.f32 %v546_v36, %v672_v41 }
  0xf4   : > { %v707_v46 = vmax.f32 %v557_v39, %v675_v43 }
  0xf5   : > { %v2174_v47 = vpop.f32.mrb[4].mxu0  ;;  %v705_v49 = vmax.f32 %v549_v42, %v673_v44 }
  0xf6   : > { %v570_v50 = vadd.f32 %v2174_v47, %v2696_v32  ;;  %v561_v51 = vpop.f32.mrb[5].mxu0  ;;  %v737_v52 = vpack.c.bf16 %v707_v46, %v706_v45 }
  0xf7   : > { %v562_v53 = vadd.f32 %v2696_v32, %v561_v51  ;;  %v2175_v54 = vpop.f32.mrb[6].mxu0  ;;  %v736_v55 = vpack.c.bf16 %v705_v49, %v704_v48 }
  0xf8   : > { %v678_v56 = vmul.f32 0.01, %v570_v50  ;;  %v573_v57 = vadd.f32 %v2175_v54, %v2696_v32  ;;  %v564_v58 = vpop.f32.mrb[7].mxu0 }
  0xf9   : > { %v676_v59 = vmul.f32 0.01, %v562_v53  ;;  %v565_v60 = vadd.f32 %v2696_v32, %v564_v58  ;;  %2216 = vmatprep.mubr.bf16.mxu1 %v736_v55 }
  0xfa   : > { %v679_v61 = vmul.f32 0.01, %v573_v57  ;;  %2217 = vmatmul.mubr.bf16.vlgmr.msra.gmra.mrb[0].mxu1 %v737_v52  ;;  %v710_v63 = vmax.f32 %v570_v50, %v678_v56 }
  0xfb   : > { %v677_v62 = vmul.f32 0.01, %v565_v60  ;;  %v708_v1 = vmax.f32 %v562_v53, %v676_v59 }
  0xfc   : > { %v711_v0 = vmax.f32 %v573_v57, %v679_v61 }
  0xfd   : > { %v709_v2 = vmax.f32 %v565_v60, %v677_v62  ;;  %v2178_v3 = vpop.f32.mrb[8].mxu0 }
  0xfe   : > { %v586_v4 = vadd.f32 %v2178_v3, %v2696_v32  ;;  %v577_v5 = vpop.f32.mrb[9].mxu0  ;;  %v739_v6 = vpack.c.bf16 %v711_v0, %v710_v63 }
  0xff   : > { %v578_v7 = vadd.f32 %v2696_v32, %v577_v5  ;;  %v2179_v8 = vpop.f32.mrb[10].mxu0  ;;  %v738_v9 = vpack.c.bf16 %v709_v2, %v708_v1 }
 0x100   : > { %v682_v10 = vmul.f32 0.01, %v586_v4  ;;  %v589_v11 = vadd.f32 %v2179_v8, %v2696_v32  ;;  %v580_v12 = vpop.f32.mrb[11].mxu0 }
 0x101   : > { %v680_v13 = vmul.f32 0.01, %v578_v7  ;;  %v581_v14 = vadd.f32 %v2696_v32, %v580_v12  ;;  %2220 = vmatprep.mubr.bf16.mxu1 %v738_v9 }
 0x102   : > { %v683_v15 = vmul.f32 0.01, %v589_v11  ;;  %2221 = vmatmul.mubr.bf16.gmra.mrb[4].mxu1 %v739_v6  ;;  %v714_v17 = vmax.f32 %v586_v4, %v682_v10 }
 0x103   : > { %v681_v16 = vmul.f32 0.01, %v581_v14  ;;  %v712_v19 = vmax.f32 %v578_v7, %v680_v13 }
 0x104   : > { %v715_v18 = vmax.f32 %v589_v11, %v683_v15 }
 0x105   : > { %v713_v20 = vmax.f32 %v581_v14, %v681_v16  ;;  %v2182_v21 = vpop.f32.mrb[12].mxu0 }
 0x106   : > { %v602_v22 = vadd.f32 %v2182_v21, %v2696_v32  ;;  %v593_v23 = vpop.f32.mrb[13].mxu0  ;;  %v741_v24 = vpack.c.bf16 %v715_v18, %v714_v17 }
 0x107   : > { %v594_v25 = vadd.f32 %v2696_v32, %v593_v23  ;;  %v2183_v26 = vpop.f32.mrb[14].mxu0  ;;  %v740_v27 = vpack.c.bf16 %v713_v20, %v712_v19 }
 0x108   : > { %v686_v28 = vmul.f32 0.01, %v602_v22  ;;  %v605_v29 = vadd.f32 %v2183_v26, %v2696_v32  ;;  %v596_v30 = vpop.f32.mrb[15].mxu0 }
 0x109   : > { %v684_v31 = vmul.f32 0.01, %v594_v25  ;;  %v597_v33 = vadd.f32 %v2696_v32, %v596_v30  ;;  %2224 = vmatprep.mubr.bf16.mxu1 %v740_v27 }
 0x10a   : > { %v687_v34 = vmul.f32 0.01, %v605_v29  ;;  %2225 = vmatmul.mubr.bf16.gmra.mrb[8].mxu1 %v741_v24  ;;  %v718_v36 = vmax.f32 %v602_v22, %v686_v28 }
 0x10b   : > { %v685_v35 = vmul.f32 0.01, %v597_v33  ;;  %v716_v38 = vmax.f32 %v594_v25, %v684_v31 }
 0x10c   : > { %v719_v37 = vmax.f32 %v605_v29, %v687_v34 }
 0x10d   : > { %v717_v39 = vmax.f32 %v597_v33, %v685_v35  ;;  %v2186_v40 = vpop.f32.mrb[16].mxu0 }
 0x10e   : > { %v618_v41 = vadd.f32 %v2186_v40, %v2696_v32  ;;  %v609_v42 = vpop.f32.mrb[17].mxu0  ;;  %v743_v43 = vpack.c.bf16 %v719_v37, %v718_v36 }
 0x10f   : > { %v610_v44 = vadd.f32 %v2696_v32, %v609_v42  ;;  %v2187_v45 = vpop.f32.mrb[18].mxu0  ;;  %v742_v46 = vpack.c.bf16 %v717_v39, %v716_v38 }
 0x110   : > { %v690_v47 = vmul.f32 0.01, %v618_v41  ;;  %v621_v48 = vadd.f32 %v2187_v45, %v2696_v32  ;;  %v612_v49 = vpop.f32.mrb[19].mxu0 }
 0x111   : > { %v688_v50 = vmul.f32 0.01, %v610_v44  ;;  %v613_v51 = vadd.f32 %v2696_v32, %v612_v49  ;;  %2228 = vmatprep.mubr.bf16.mxu1 %v742_v46 }
 0x112   : > { %v691_v52 = vmul.f32 0.01, %v621_v48  ;;  %2229 = vmatmul.mubr.bf16.gmra.mrb[12].mxu1 %v743_v43  ;;  %v722_v54 = vmax.f32 %v618_v41, %v690_v47 }
 0x113   : > { %v689_v53 = vmul.f32 0.01, %v613_v51  ;;  %v720_v56 = vmax.f32 %v610_v44, %v688_v50 }
 0x114   : > { %v723_v55 = vmax.f32 %v621_v48, %v691_v52  ;;  %v2739_v52 = vld [vmem:[%s2978_s7 + $0x8] sm:$0xff]  }
 0x115   : > { %v721_v57 = vmax.f32 %v613_v51, %v689_v53  ;;  %v2190_v58 = vpop.f32.mrb[20].mxu0  ;;  %v2433_v51 = vld [vmem:[%s2976_s5 + $0x38] sm:$0xff]   ;;  %v2745_v53 = vld [vmem:[%s2978_s7 + $0x10] sm:$0xff]  }
 0x116   : > { %v634_v59 = vadd.f32 %v2190_v58, %v2696_v32  ;;  %v625_v60 = vpop.f32.mrb[21].mxu0  ;;  %v745_v61 = vpack.c.bf16 %v723_v55, %v722_v54  ;;  %2262 = vmatprep.subr.bf16.mxu0 %v2433_v51  ;;  %v2752_v54 = vld [vmem:[%s2978_s7 + $0x18] sm:$0xff]   ;;  %v2759_v55 = vld [vmem:[%s2978_s7 + $0x20] sm:$0xff]  }
 0x117   : > { %v626_v62 = vadd.f32 %v2696_v32, %v625_v60  ;;  %v2191_v63 = vpop.f32.mrb[22].mxu0  ;;  %v744_v0 = vpack.c.bf16 %v721_v57, %v720_v56  ;;  %2263 = vmatpush3.bf16.msra.mxu0 %v2433_v51  ;;  %v2766_v56 = vld [vmem:[%s2978_s7 + $0x28] sm:$0xff]   ;;  %v2774_v57 = vld [vmem:[%s2975_s4] ss:$0 sm:$0xff] }
 0x118   : > { %v694_v1 = vmul.f32 0.01, %v634_v59  ;;  %v637_v2 = vadd.f32 %v2191_v63, %v2696_v32  ;;  %v628_v3 = vpop.f32.mrb[23].mxu0 }
 0x119   : > { %v692_v4 = vmul.f32 0.01, %v626_v62  ;;  %v629_v5 = vadd.f32 %v2696_v32, %v628_v3  ;;  %2232 = vmatprep.mubr.bf16.mxu1 %v744_v0 }
 0x11a   : > { %v695_v6 = vmul.f32 0.01, %v637_v2  ;;  %2233 = vmatmul.mubr.bf16.gmra.mrb[16].mxu1 %v745_v61  ;;  %v726_v8 = vmax.f32 %v634_v59, %v694_v1 }
 0x11b   : > { %v693_v7 = vmul.f32 0.01, %v629_v5  ;;  %v724_v10 = vmax.f32 %v626_v62, %v692_v4 }
 0x11c   : > { %v727_v9 = vmax.f32 %v637_v2, %v695_v6 }
 0x11d   : > { %v725_v11 = vmax.f32 %v629_v5, %v693_v7  ;;  %v2194_v12 = vpop.f32.mrb[24].mxu0 }
 0x11e   : > { %v650_v13 = vadd.f32 %v2194_v12, %v2696_v32  ;;  %v641_v14 = vpop.f32.mrb[25].mxu0  ;;  %v747_v15 = vpack.c.bf16 %v727_v9, %v726_v8 }
 0x11f   : > { %v642_v16 = vadd.f32 %v2696_v32, %v641_v14  ;;  %v2195_v17 = vpop.f32.mrb[26].mxu0  ;;  %v746_v18 = vpack.c.bf16 %v725_v11, %v724_v10 }
 0x120   : > { %v698_v19 = vmul.f32 0.01, %v650_v13  ;;  %v653_v20 = vadd.f32 %v2195_v17, %v2696_v32  ;;  %v644_v21 = vpop.f32.mrb[27].mxu0 }
 0x121   : > { %v696_v22 = vmul.f32 0.01, %v642_v16  ;;  %v645_v23 = vadd.f32 %v2696_v32, %v644_v21  ;;  %2236 = vmatprep.mubr.bf16.mxu1 %v746_v18 }
 0x122   : > { %v699_v24 = vmul.f32 0.01, %v653_v20  ;;  %2237 = vmatmul.mubr.bf16.gmra.mrb[20].mxu1 %v747_v15  ;;  %v730_v26 = vmax.f32 %v650_v13, %v698_v19 }
 0x123   : > { %v697_v25 = vmul.f32 0.01, %v645_v23  ;;  %v728_v28 = vmax.f32 %v642_v16, %v696_v22 }
 0x124   : > { %v731_v27 = vmax.f32 %v653_v20, %v699_v24 }
 0x125   : > { %v729_v29 = vmax.f32 %v645_v23, %v697_v25  ;;  %v2198_v30 = vpop.f32.mrb[28].mxu0 }
 0x126   : > { %v666_v31 = vadd.f32 %v2198_v30, %v2696_v32  ;;  %v657_v33 = vpop.f32.mrb[29].mxu0  ;;  %v749_v34 = vpack.c.bf16 %v731_v27, %v730_v26 }
 0x127   : > { %v658_v35 = vadd.f32 %v2696_v32, %v657_v33  ;;  %v2199_v36 = vpop.f32.mrb[30].mxu0  ;;  %v748_v37 = vpack.c.bf16 %v729_v29, %v728_v28 }
 0x128   : > { %v702_v38 = vmul.f32 0.01, %v666_v31  ;;  %v669_v39 = vadd.f32 %v2199_v36, %v2696_v32  ;;  %v660_v40 = vpop.f32.mrb[31].mxu0 }
 0x129   : > { %v700_v41 = vmul.f32 0.01, %v658_v35  ;;  %v661_v42 = vadd.f32 %v2696_v32, %v660_v40  ;;  %2240 = vmatprep.mubr.bf16.mxu1 %v748_v37  ;;  %v2434_v32 = vld [vmem:[%s2978_s7] sm:$0xff]  }
 0x12a   : > { %v703_v43 = vmul.f32 0.01, %v669_v39  ;;  %2241 = vmatmul.mubr.bf16.gmra.mrb[24].mxu1 %v749_v34  ;;  %v734_v45 = vmax.f32 %v666_v31, %v702_v38  ;;  %2344 = vmatprep.subr.bf16.mxu1 %v2434_v32 }
 0x12b   : > { %v701_v44 = vmul.f32 0.01, %v661_v42  ;;  %v732_v47 = vmax.f32 %v658_v35, %v700_v41  ;;  %2296 = vmatprep.subr.bf16.mxu0 %v2434_v32  ;;  %2352 = vmatpush3.bf16.msra.mxu1 %v2434_v32 }
 0x12c   : > { %v735_v46 = vmax.f32 %v669_v39, %v703_v43  ;;  %2345 = vmatprep.subr.bf16.mxu1 %v2739_v52 }
 0x12d   : > { %v733_v48 = vmax.f32 %v661_v42, %v701_v44 }
 0x12e   : > { %v751_v49 = vpack.c.bf16 %v735_v46, %v734_v45 }
 0x12f   : > { %v750_v50 = vpack.c.bf16 %v733_v48, %v732_v47  ;;  %2353 = vmatpush3.bf16.msra.mxu1 %v2739_v52 }
 0x130   : > { %2346 = vmatprep.subr.bf16.mxu1 %v2745_v53 }
 0x131   : > { %2244 = vmatprep.mubr.bf16.mxu1 %v750_v50 }
 0x132   : > { %2245 = vmatmul.mubr.bf16.gmra.mrb[28].mxu1 %v751_v49 }
 0x133   : > { %2354 = vmatpush3.bf16.msra.mxu1 %v2745_v53 }
 0x134   : > { %2347 = vmatprep.subr.bf16.mxu1 %v2752_v54 }
 0x137   : > { %2355 = vmatpush3.bf16.msra.mxu1 %v2752_v54 }
 0x138   : > { %2348 = vmatprep.subr.bf16.mxu1 %v2759_v55 }
 0x13b   : > { %2356 = vmatpush3.bf16.msra.mxu1 %v2759_v55 }
 0x13c   : > { %2349 = vmatprep.subr.bf16.mxu1 %v2766_v56 }
 0x13f   : > { %2357 = vmatpush3.bf16.msra.mxu1 %v2766_v56 }
 0x1cd   : > { %v2218_v58 = vpop.f32.mrb[0].mxu1 }
 0x1ce   : > { %v866_v59 = vadd.f32 %v2218_v58, %v2774_v57  ;;  %v857_v60 = vpop.f32.mrb[1].mxu1 }
 0x1cf   : > { %v858_v61 = vadd.f32 %v2774_v57, %v857_v60  ;;  %v2219_v62 = vpop.f32.mrb[2].mxu1 }
 0x1d0   : > { %v986_v63 = vmul.f32 0.01, %v866_v59  ;;  %v869_v0 = vadd.f32 %v2219_v62, %v2774_v57  ;;  %v860_v1 = vpop.f32.mrb[3].mxu1 }
 0x1d1   : > { %v984_v2 = vmul.f32 0.01, %v858_v61  ;;  %v861_v3 = vadd.f32 %v2774_v57, %v860_v1 }
 0x1d2   : > { %v987_v4 = vmul.f32 0.01, %v869_v0  ;;  %v1018_v6 = vmax.f32 %v866_v59, %v986_v63 }
 0x1d3   : > { %v985_v5 = vmul.f32 0.01, %v861_v3  ;;  %v1016_v8 = vmax.f32 %v858_v61, %v984_v2 }
 0x1d4   : > { %v1019_v7 = vmax.f32 %v869_v0, %v987_v4 }
 0x1d5   : > { %v1017_v9 = vmax.f32 %v861_v3, %v985_v5  ;;  %v2222_v10 = vpop.f32.mrb[4].mxu1 }
 0x1d6   : > { %v1049_v11 = vpack.c.bf16 %v1019_v7, %v1018_v6  ;;  %v882_v12 = vadd.f32 %v2222_v10, %v2774_v57  ;;  %v873_v13 = vpop.f32.mrb[5].mxu1 }
 0x1d7   : > { %v874_v14 = vadd.f32 %v2774_v57, %v873_v13  ;;  %v2223_v15 = vpop.f32.mrb[6].mxu1  ;;  %v1048_v16 = vpack.c.bf16 %v1017_v9, %v1016_v8 }
 0x1d8   : > { %v990_v17 = vmul.f32 0.01, %v882_v12  ;;  %v885_v18 = vadd.f32 %v2223_v15, %v2774_v57  ;;  %v876_v19 = vpop.f32.mrb[7].mxu1 }
 0x1d9   : > { %v988_v20 = vmul.f32 0.01, %v874_v14  ;;  %v877_v21 = vadd.f32 %v2774_v57, %v876_v19  ;;  %2264 = vmatprep.mubr.bf16.mxu0 %v1048_v16 }
 0x1da   : > { %v991_v22 = vmul.f32 0.01, %v885_v18  ;;  %2265 = vmatmul.mubr.bf16.vlgmr.msra.gmra.mrb[32].mxu0 %v1049_v11  ;;  %v1022_v24 = vmax.f32 %v882_v12, %v990_v17 }
 0x1db   : > { %v989_v23 = vmul.f32 0.01, %v877_v21  ;;  %2297 = vmatpush3.bf16.msra.mxu0 %v2434_v32  ;;  %v1020_v26 = vmax.f32 %v874_v14, %v988_v20 }
 0x1dc   : > { %v1023_v25 = vmax.f32 %v885_v18, %v991_v22  ;;  %2298 = vmatprep.subr.bf16.mxu0 %v2739_v52 }
 0x1dd   : > { %v1021_v27 = vmax.f32 %v877_v21, %v989_v23  ;;  %v2226_v28 = vpop.f32.mrb[8].mxu1 }
 0x1de   : > { %v898_v29 = vadd.f32 %v2226_v28, %v2774_v57  ;;  %v889_v30 = vpop.f32.mrb[9].mxu1  ;;  %v1051_v31 = vpack.c.bf16 %v1023_v25, %v1022_v24 }
 0x1df   : > { %v890_v33 = vadd.f32 %v2774_v57, %v889_v30  ;;  %v2227_v34 = vpop.f32.mrb[10].mxu1  ;;  %v1050_v35 = vpack.c.bf16 %v1021_v27, %v1020_v26  ;;  %2299 = vmatpush3.bf16.msra.mxu0 %v2739_v52 }
 0x1e0   : > { %v994_v36 = vmul.f32 0.01, %v898_v29  ;;  %v901_v37 = vadd.f32 %v2227_v34, %v2774_v57  ;;  %v892_v38 = vpop.f32.mrb[11].mxu1  ;;  %2300 = vmatprep.subr.bf16.mxu0 %v2745_v53 }
 0x1e1   : > { %v992_v39 = vmul.f32 0.01, %v890_v33  ;;  %v893_v40 = vadd.f32 %v2774_v57, %v892_v38  ;;  %2268 = vmatprep.mubr.bf16.mxu0 %v1050_v35 }
 0x1e2   : > { %v995_v41 = vmul.f32 0.01, %v901_v37  ;;  %2269 = vmatmul.mubr.bf16.gmra.mrb[36].mxu0 %v1051_v31  ;;  %v1026_v43 = vmax.f32 %v898_v29, %v994_v36 }
 0x1e3   : > { %v993_v42 = vmul.f32 0.01, %v893_v40  ;;  %2301 = vmatpush3.bf16.msra.mxu0 %v2745_v53  ;;  %v1024_v45 = vmax.f32 %v890_v33, %v992_v39 }
 0x1e4   : > { %v1027_v44 = vmax.f32 %v901_v37, %v995_v41  ;;  %2302 = vmatprep.subr.bf16.mxu0 %v2752_v54 }
 0x1e5   : > { %v1025_v46 = vmax.f32 %v893_v40, %v993_v42  ;;  %v2230_v47 = vpop.f32.mrb[12].mxu1 }
 0x1e6   : > { %v914_v48 = vadd.f32 %v2230_v47, %v2774_v57  ;;  %v905_v49 = vpop.f32.mrb[13].mxu1  ;;  %v1053_v50 = vpack.c.bf16 %v1027_v44, %v1026_v43 }
 0x1e7   : > { %v906_v51 = vadd.f32 %v2774_v57, %v905_v49  ;;  %v2231_v32 = vpop.f32.mrb[14].mxu1  ;;  %v1052_v52 = vpack.c.bf16 %v1025_v46, %v1024_v45  ;;  %2303 = vmatpush3.bf16.msra.mxu0 %v2752_v54 }
 0x1e8   : > { %v998_v58 = vmul.f32 0.01, %v914_v48  ;;  %v917_v53 = vadd.f32 %v2231_v32, %v2774_v57  ;;  %v908_v59 = vpop.f32.mrb[15].mxu1  ;;  %2304 = vmatprep.subr.bf16.mxu0 %v2759_v55 }
 0x1e9   : > { %v996_v60 = vmul.f32 0.01, %v906_v51  ;;  %v909_v61 = vadd.f32 %v2774_v57, %v908_v59  ;;  %2272 = vmatprep.mubr.bf16.mxu0 %v1052_v52 }
 0x1ea   : > { %v999_v62 = vmul.f32 0.01, %v917_v53  ;;  %2273 = vmatmul.mubr.bf16.gmra.mrb[40].mxu0 %v1053_v50  ;;  %v1030_v0 = vmax.f32 %v914_v48, %v998_v58 }
 0x1eb   : > { %v997_v63 = vmul.f32 0.01, %v909_v61  ;;  %2305 = vmatpush3.bf16.msra.mxu0 %v2759_v55  ;;  %v1028_v54 = vmax.f32 %v906_v51, %v996_v60 }
 0x1ec   : > { %v1031_v1 = vmax.f32 %v917_v53, %v999_v62  ;;  %2306 = vmatprep.subr.bf16.mxu0 %v2766_v56 }
 0x1ed   : > { %v1029_v2 = vmax.f32 %v909_v61, %v997_v63  ;;  %v2234_v3 = vpop.f32.mrb[16].mxu1 }
 0x1ee   : > { %v930_v4 = vadd.f32 %v2234_v3, %v2774_v57  ;;  %v921_v5 = vpop.f32.mrb[17].mxu1  ;;  %v1055_v6 = vpack.c.bf16 %v1031_v1, %v1030_v0 }
 0x1ef   : > { %v922_v7 = vadd.f32 %v2774_v57, %v921_v5  ;;  %v2235_v8 = vpop.f32.mrb[18].mxu1  ;;  %v1054_v9 = vpack.c.bf16 %v1029_v2, %v1028_v54  ;;  %2307 = vmatpush3.bf16.msra.mxu0 %v2766_v56 }
 0x1f0   : > { %v1002_v10 = vmul.f32 0.01, %v930_v4  ;;  %v933_v55 = vadd.f32 %v2235_v8, %v2774_v57  ;;  %v924_v11 = vpop.f32.mrb[19].mxu1 }
 0x1f1   : > { %v1000_v12 = vmul.f32 0.01, %v922_v7  ;;  %v925_v13 = vadd.f32 %v2774_v57, %v924_v11  ;;  %2276 = vmatprep.mubr.bf16.mxu0 %v1054_v9 }
 0x1f2   : > { %v1003_v14 = vmul.f32 0.01, %v933_v55  ;;  %2277 = vmatmul.mubr.bf16.gmra.mrb[44].mxu0 %v1055_v6  ;;  %v1034_v16 = vmax.f32 %v930_v4, %v1002_v10 }
 0x1f3   : > { %v1001_v15 = vmul.f32 0.01, %v925_v13  ;;  %v1032_v18 = vmax.f32 %v922_v7, %v1000_v12 }
 0x1f4   : > { %v1035_v17 = vmax.f32 %v933_v55, %v1003_v14  ;;  %v2827_v14 = vld [vmem:[%s2977_s6] ss:$0 sm:$0xff] }
 0x1f5   : > { %v1033_v19 = vmax.f32 %v925_v13, %v1001_v15  ;;  %v2238_v20 = vpop.f32.mrb[20].mxu1  ;;  %v2440_v13 = vld [vmem:[%s2978_s7 + $0x30] sm:$0xff]  }
 0x1f6   : > { %v946_v21 = vadd.f32 %v2238_v20, %v2774_v57  ;;  %v937_v22 = vpop.f32.mrb[21].mxu1  ;;  %v1057_v56 = vpack.c.bf16 %v1035_v17, %v1034_v16  ;;  %2350 = vmatprep.subr.bf16.mxu1 %v2440_v13  ;;  %2308 = vmatprep.subr.bf16.mxu0 %v2440_v13 }
 0x1f7   : > { %v938_v23 = vadd.f32 %v2774_v57, %v937_v22  ;;  %v2239_v24 = vpop.f32.mrb[22].mxu1  ;;  %v1056_v25 = vpack.c.bf16 %v1033_v19, %v1032_v18  ;;  %2358 = vmatpush3.bf16.msra.mxu1 %v2440_v13  ;;  %2309 = vmatpush3.bf16.msra.mxu0 %v2440_v13 }
 0x1f8   : > { %v1006_v26 = vmul.f32 0.01, %v946_v21  ;;  %v949_v27 = vadd.f32 %v2239_v24, %v2774_v57  ;;  %v940_v28 = vpop.f32.mrb[23].mxu1 }
 0x1f9   : > { %v1004_v29 = vmul.f32 0.01, %v938_v23  ;;  %v941_v30 = vadd.f32 %v2774_v57, %v940_v28  ;;  %2280 = vmatprep.mubr.bf16.mxu0 %v1056_v25 }
 0x1fa   : > { %v1007_v31 = vmul.f32 0.01, %v949_v27  ;;  %2281 = vmatmul.mubr.bf16.gmra.mrb[48].mxu0 %v1057_v56  ;;  %v1038_v34 = vmax.f32 %v946_v21, %v1006_v26 }
 0x1fb   : > { %v1005_v33 = vmul.f32 0.01, %v941_v30  ;;  %v1036_v36 = vmax.f32 %v938_v23, %v1004_v29 }
 0x1fc   : > { %v1039_v35 = vmax.f32 %v949_v27, %v1007_v31 }
 0x1fd   : > { %v1037_v37 = vmax.f32 %v941_v30, %v1005_v33  ;;  %v2242_v38 = vpop.f32.mrb[24].mxu1 }
 0x1fe   : > { %v962_v39 = vadd.f32 %v2242_v38, %v2774_v57  ;;  %v953_v40 = vpop.f32.mrb[25].mxu1  ;;  %v1059_v41 = vpack.c.bf16 %v1039_v35, %v1038_v34 }
 0x1ff   : > { %v954_v42 = vadd.f32 %v2774_v57, %v953_v40  ;;  %v2243_v43 = vpop.f32.mrb[26].mxu1  ;;  %v1058_v44 = vpack.c.bf16 %v1037_v37, %v1036_v36 }
 0x200   : > { %v1010_v45 = vmul.f32 0.01, %v962_v39  ;;  %v965_v46 = vadd.f32 %v2243_v43, %v2774_v57  ;;  %v956_v47 = vpop.f32.mrb[27].mxu1 }
 0x201   : > { %v1008_v48 = vmul.f32 0.01, %v954_v42  ;;  %v957_v49 = vadd.f32 %v2774_v57, %v956_v47  ;;  %2284 = vmatprep.mubr.bf16.mxu0 %v1058_v44 }
 0x202   : > { %v1011_v50 = vmul.f32 0.01, %v965_v46  ;;  %2285 = vmatmul.mubr.bf16.gmra.mrb[52].mxu0 %v1059_v41  ;;  %v1042_v32 = vmax.f32 %v962_v39, %v1010_v45 }
 0x203   : > { %v1009_v51 = vmul.f32 0.01, %v957_v49  ;;  %v1040_v58 = vmax.f32 %v954_v42, %v1008_v48 }
 0x204   : > { %v1043_v52 = vmax.f32 %v965_v46, %v1011_v50 }
 0x205   : > { %v1041_v53 = vmax.f32 %v957_v49, %v1009_v51  ;;  %v2246_v59 = vpop.f32.mrb[28].mxu1 }
 0x206   : > { %v978_v60 = vadd.f32 %v2246_v59, %v2774_v57  ;;  %v969_v61 = vpop.f32.mrb[29].mxu1  ;;  %v1061_v62 = vpack.c.bf16 %v1043_v52, %v1042_v32 }
 0x207   : > { %v970_v63 = vadd.f32 %v2774_v57, %v969_v61  ;;  %v2247_v0 = vpop.f32.mrb[30].mxu1  ;;  %v1060_v1 = vpack.c.bf16 %v1041_v53, %v1040_v58 }
 0x208   : > { %v1014_v54 = vmul.f32 0.01, %v978_v60  ;;  %v981_v2 = vadd.f32 %v2247_v0, %v2774_v57  ;;  %v972_v3 = vpop.f32.mrb[31].mxu1 }
 0x209   : > { %v1012_v4 = vmul.f32 0.01, %v970_v63  ;;  %v973_v5 = vadd.f32 %v2774_v57, %v972_v3  ;;  %2288 = vmatprep.mubr.bf16.mxu0 %v1060_v1  ;;  %v2441_v57 = vld [vmem:[%s2978_s7 + $0x38] sm:$0xff]  }
 0x20a   : > { %v1015_v6 = vmul.f32 0.01, %v981_v2  ;;  %2289 = vmatmul.mubr.bf16.gmra.mrb[56].mxu0 %v1061_v62  ;;  %v1046_v8 = vmax.f32 %v978_v60, %v1014_v54  ;;  %2310 = vmatprep.subr.bf16.mxu0 %v2441_v57 }
 0x20b   : > { %v1013_v7 = vmul.f32 0.01, %v973_v5  ;;  %v1044_v10 = vmax.f32 %v970_v63, %v1012_v4  ;;  %2351 = vmatprep.subr.bf16.mxu1 %v2441_v57  ;;  %2311 = vmatpush3.bf16.msra.mxu0 %v2441_v57 }
 0x20c   : > { %v1047_v9 = vmax.f32 %v981_v2, %v1015_v6  ;;  %2359 = vmatpush3.bf16.msra.mxu1 %v2441_v57 }
 0x20d   : > { %v1045_v55 = vmax.f32 %v973_v5, %v1013_v7 }
 0x20e   : > { %v1063_v11 = vpack.c.bf16 %v1047_v9, %v1046_v8 }
 0x20f   : > { %v1062_v12 = vpack.c.bf16 %v1045_v55, %v1044_v10 }
 0x211   : > { %2292 = vmatprep.mubr.bf16.mxu0 %v1062_v12 }
 0x212   : > { %2293 = vmatmul.mubr.bf16.gmra.mrb[60].mxu0 %v1063_v11 }
 0x2ad   : > { %v2266_v15 = vpop.f32.mrb[32].mxu0 }
 0x2ae   : > { %v1178_v16 = vadd.f32 %v2266_v15, %v2827_v14  ;;  %v1169_v17 = vpop.f32.mrb[33].mxu0 }
 0x2af   : > { %v1170_v18 = vadd.f32 %v2827_v14, %v1169_v17  ;;  %v2267_v19 = vpop.f32.mrb[34].mxu0 }
 0x2b0   : > { %v1298_v20 = vmul.f32 0.01, %v1178_v16  ;;  %v1181_v21 = vadd.f32 %v2267_v19, %v2827_v14  ;;  %v1172_v22 = vpop.f32.mrb[35].mxu0 }
 0x2b1   : > { %v1296_v56 = vmul.f32 0.01, %v1170_v18  ;;  %v1173_v23 = vadd.f32 %v2827_v14, %v1172_v22 }
 0x2b2   : > { %v1299_v24 = vmul.f32 0.01, %v1181_v21  ;;  %v1330_v26 = vmax.f32 %v1178_v16, %v1298_v20 }
 0x2b3   : > { %v1297_v25 = vmul.f32 0.01, %v1173_v23  ;;  %v1328_v28 = vmax.f32 %v1170_v18, %v1296_v56 }
 0x2b4   : > { %v1331_v27 = vmax.f32 %v1181_v21, %v1299_v24 }
 0x2b5   : > { %v1329_v29 = vmax.f32 %v1173_v23, %v1297_v25  ;;  %v2270_v30 = vpop.f32.mrb[36].mxu0 }
 0x2b6   : > { %v1361_v31 = vpack.c.bf16 %v1331_v27, %v1330_v26  ;;  %v1194_v33 = vadd.f32 %v2270_v30, %v2827_v14  ;;  %v1185_v34 = vpop.f32.mrb[37].mxu0 }
 0x2b7   : > { %v1186_v35 = vadd.f32 %v2827_v14, %v1185_v34  ;;  %v2271_v36 = vpop.f32.mrb[38].mxu0  ;;  %v1360_v37 = vpack.c.bf16 %v1329_v29, %v1328_v28 }
 0x2b8   : > { %v1302_v38 = vmul.f32 0.01, %v1194_v33  ;;  %v1197_v39 = vadd.f32 %v2271_v36, %v2827_v14  ;;  %v1188_v40 = vpop.f32.mrb[39].mxu0 }
 0x2b9   : > { %v1300_v41 = vmul.f32 0.01, %v1186_v35  ;;  %v1189_v42 = vadd.f32 %v2827_v14, %v1188_v40  ;;  %2312 = vmatprep.mubr.bf16.mxu0 %v1360_v37 }
 0x2ba   : > { %v1303_v43 = vmul.f32 0.01, %v1197_v39  ;;  %2313 = vmatmul.mubr.bf16.vlgmr.msra.gmra.mrb[64].mxu0 %v1361_v31  ;;  %v1334_v45 = vmax.f32 %v1194_v33, %v1302_v38 }
 0x2bb   : > { %v1301_v44 = vmul.f32 0.01, %v1189_v42  ;;  %v1332_v47 = vmax.f32 %v1186_v35, %v1300_v41 }
 0x2bc   : > { %v1335_v46 = vmax.f32 %v1197_v39, %v1303_v43 }
 0x2bd   : > { %v1333_v48 = vmax.f32 %v1189_v42, %v1301_v44  ;;  %v2274_v49 = vpop.f32.mrb[40].mxu0 }
 0x2be   : > { %v1363_v50 = vpack.c.bf16 %v1335_v46, %v1334_v45  ;;  %v1210_v51 = vadd.f32 %v2274_v49, %v2827_v14  ;;  %v1201_v32 = vpop.f32.mrb[41].mxu0 }
 0x2bf   : > { %v1202_v52 = vadd.f32 %v2827_v14, %v1201_v32  ;;  %v2275_v58 = vpop.f32.mrb[42].mxu0  ;;  %v1362_v53 = vpack.c.bf16 %v1333_v48, %v1332_v47 }
 0x2c0   : > { %v1306_v59 = vmul.f32 0.01, %v1210_v51  ;;  %v1213_v60 = vadd.f32 %v2275_v58, %v2827_v14  ;;  %v1204_v61 = vpop.f32.mrb[43].mxu0 }
 0x2c1   : > { %v1304_v62 = vmul.f32 0.01, %v1202_v52  ;;  %v1205_v63 = vadd.f32 %v2827_v14, %v1204_v61  ;;  %2316 = vmatprep.mubr.bf16.mxu1 %v1362_v53 }
 0x2c2   : > { %v1307_v0 = vmul.f32 0.01, %v1213_v60  ;;  %2317 = vmatmul.mubr.bf16.vlgmr.msra.gmra.mrb[32].mxu1 %v1363_v50  ;;  %v1338_v54 = vmax.f32 %v1210_v51, %v1306_v59 }
 0x2c3   : > { %v1305_v1 = vmul.f32 0.01, %v1205_v63  ;;  %v1336_v3 = vmax.f32 %v1202_v52, %v1304_v62 }
 0x2c4   : > { %v1339_v2 = vmax.f32 %v1213_v60, %v1307_v0 }
 0x2c5   : > { %v1337_v4 = vmax.f32 %v1205_v63, %v1305_v1  ;;  %v2278_v5 = vpop.f32.mrb[44].mxu0 }
 0x2c6   : > { %v1226_v6 = vadd.f32 %v2278_v5, %v2827_v14  ;;  %v1217_v7 = vpop.f32.mrb[45].mxu0  ;;  %v1365_v8 = vpack.c.bf16 %v1339_v2, %v1338_v54 }
 0x2c7   : > { %v1218_v9 = vadd.f32 %v2827_v14, %v1217_v7  ;;  %v2279_v10 = vpop.f32.mrb[46].mxu0  ;;  %v1364_v55 = vpack.c.bf16 %v1337_v4, %v1336_v3 }
 0x2c8   : > { %v1310_v11 = vmul.f32 0.01, %v1226_v6  ;;  %v1229_v12 = vadd.f32 %v2279_v10, %v2827_v14  ;;  %v1220_v13 = vpop.f32.mrb[47].mxu0 }
 0x2c9   : > { %v1308_v57 = vmul.f32 0.01, %v1218_v9  ;;  %v1221_v15 = vadd.f32 %v2827_v14, %v1220_v13  ;;  %2320 = vmatprep.mubr.bf16.mxu1 %v1364_v55 }
 0x2ca   : > { %v1311_v16 = vmul.f32 0.01, %v1229_v12  ;;  %2321 = vmatmul.mubr.bf16.gmra.mrb[36].mxu1 %v1365_v8  ;;  %v1342_v18 = vmax.f32 %v1226_v6, %v1310_v11 }
 0x2cb   : > { %v1309_v17 = vmul.f32 0.01, %v1221_v15  ;;  %v1340_v20 = vmax.f32 %v1218_v9, %v1308_v57 }
 0x2cc   : > { %v1343_v19 = vmax.f32 %v1229_v12, %v1311_v16 }
 0x2cd   : > { %v1341_v21 = vmax.f32 %v1221_v15, %v1309_v17  ;;  %v2282_v22 = vpop.f32.mrb[48].mxu0 }
 0x2ce   : > { %v1242_v56 = vadd.f32 %v2282_v22, %v2827_v14  ;;  %v1233_v23 = vpop.f32.mrb[49].mxu0  ;;  %v1367_v24 = vpack.c.bf16 %v1343_v19, %v1342_v18 }
 0x2cf   : > { %v1234_v25 = vadd.f32 %v2827_v14, %v1233_v23  ;;  %v2283_v26 = vpop.f32.mrb[50].mxu0  ;;  %v1366_v27 = vpack.c.bf16 %v1341_v21, %v1340_v20 }
 0x2d0   : > { %v1314_v28 = vmul.f32 0.01, %v1242_v56  ;;  %v1245_v29 = vadd.f32 %v2283_v26, %v2827_v14  ;;  %v1236_v30 = vpop.f32.mrb[51].mxu0 }
 0x2d1   : > { %v1312_v31 = vmul.f32 0.01, %v1234_v25  ;;  %v1237_v33 = vadd.f32 %v2827_v14, %v1236_v30  ;;  %2324 = vmatprep.mubr.bf16.mxu1 %v1366_v27 }
 0x2d2   : > { %v1315_v34 = vmul.f32 0.01, %v1245_v29  ;;  %2325 = vmatmul.mubr.bf16.gmra.mrb[40].mxu1 %v1367_v24  ;;  %v1346_v36 = vmax.f32 %v1242_v56, %v1314_v28 }
 0x2d3   : > { %v1313_v35 = vmul.f32 0.01, %v1237_v33  ;;  %v1344_v38 = vmax.f32 %v1234_v25, %v1312_v31 }
 0x2d4   : > { %v1347_v37 = vmax.f32 %v1245_v29, %v1315_v34  ;;  %v2865_v34 = vld [vmem:[%s2979_s8] ss:$0 sm:$0xff] }
 0x2d5   : > { %v1345_v39 = vmax.f32 %v1237_v33, %v1313_v35  ;;  %v2286_v40 = vpop.f32.mrb[52].mxu0 }
 0x2d6   : > { %v1258_v41 = vadd.f32 %v2286_v40, %v2827_v14  ;;  %v1249_v42 = vpop.f32.mrb[53].mxu0  ;;  %v1369_v43 = vpack.c.bf16 %v1347_v37, %v1346_v36 }
 0x2d7   : > { %v1250_v44 = vadd.f32 %v2827_v14, %v1249_v42  ;;  %v2287_v45 = vpop.f32.mrb[54].mxu0  ;;  %v1368_v46 = vpack.c.bf16 %v1345_v39, %v1344_v38 }
 0x2d8   : > { %v1318_v47 = vmul.f32 0.01, %v1258_v41  ;;  %v1261_v48 = vadd.f32 %v2287_v45, %v2827_v14  ;;  %v1252_v49 = vpop.f32.mrb[55].mxu0 }
 0x2d9   : > { %v1316_v50 = vmul.f32 0.01, %v1250_v44  ;;  %v1253_v51 = vadd.f32 %v2827_v14, %v1252_v49  ;;  %2328 = vmatprep.mubr.bf16.mxu1 %v1368_v46 }
 0x2da   : > { %v1319_v32 = vmul.f32 0.01, %v1261_v48  ;;  %2329 = vmatmul.mubr.bf16.gmra.mrb[44].mxu1 %v1369_v43  ;;  %v1350_v58 = vmax.f32 %v1258_v41, %v1318_v47 }
 0x2db   : > { %v1317_v52 = vmul.f32 0.01, %v1253_v51  ;;  %v1348_v59 = vmax.f32 %v1250_v44, %v1316_v50 }
 0x2dc   : > { %v1351_v53 = vmax.f32 %v1261_v48, %v1319_v32 }
 0x2dd   : > { %v1349_v60 = vmax.f32 %v1253_v51, %v1317_v52  ;;  %v2290_v61 = vpop.f32.mrb[56].mxu0 }
 0x2de   : > { %v1274_v62 = vadd.f32 %v2290_v61, %v2827_v14  ;;  %v1265_v63 = vpop.f32.mrb[57].mxu0  ;;  %v1371_v0 = vpack.c.bf16 %v1351_v53, %v1350_v58 }
 0x2df   : > { %v1266_v1 = vadd.f32 %v2827_v14, %v1265_v63  ;;  %v2291_v54 = vpop.f32.mrb[58].mxu0  ;;  %v1370_v2 = vpack.c.bf16 %v1349_v60, %v1348_v59 }
 0x2e0   : > { %v1322_v3 = vmul.f32 0.01, %v1274_v62  ;;  %v1277_v4 = vadd.f32 %v2291_v54, %v2827_v14  ;;  %v1268_v5 = vpop.f32.mrb[59].mxu0 }
 0x2e1   : > { %v1320_v6 = vmul.f32 0.01, %v1266_v1  ;;  %v1269_v7 = vadd.f32 %v2827_v14, %v1268_v5  ;;  %2332 = vmatprep.mubr.bf16.mxu1 %v1370_v2 }
 0x2e2   : > { %v1323_v8 = vmul.f32 0.01, %v1277_v4  ;;  %2333 = vmatmul.mubr.bf16.gmra.mrb[48].mxu1 %v1371_v0  ;;  %v1354_v10 = vmax.f32 %v1274_v62, %v1322_v3 }
 0x2e3   : > { %v1321_v9 = vmul.f32 0.01, %v1269_v7  ;;  %v1352_v11 = vmax.f32 %v1266_v1, %v1320_v6 }
 0x2e4   : > { %v1355_v55 = vmax.f32 %v1277_v4, %v1323_v8 }
 0x2e5   : > { %v1353_v12 = vmax.f32 %v1269_v7, %v1321_v9  ;;  %v2294_v13 = vpop.f32.mrb[60].mxu0 }
 0x2e6   : > { %v1290_v57 = vadd.f32 %v2294_v13, %v2827_v14  ;;  %v1281_v15 = vpop.f32.mrb[61].mxu0  ;;  %v1373_v16 = vpack.c.bf16 %v1355_v55, %v1354_v10 }
 0x2e7   : > { %v1282_v17 = vadd.f32 %v2827_v14, %v1281_v15  ;;  %v2295_v18 = vpop.f32.mrb[62].mxu0  ;;  %v1372_v19 = vpack.c.bf16 %v1353_v12, %v1352_v11 }
 0x2e8   : > { %v1326_v20 = vmul.f32 0.01, %v1290_v57  ;;  %v1293_v21 = vadd.f32 %v2295_v18, %v2827_v14  ;;  %v1284_v22 = vpop.f32.mrb[63].mxu0 }
 0x2e9   : > { %v1324_v56 = vmul.f32 0.01, %v1282_v17  ;;  %v1285_v23 = vadd.f32 %v2827_v14, %v1284_v22  ;;  %2336 = vmatprep.mubr.bf16.mxu1 %v1372_v19 }
 0x2ea   : > { %v1327_v24 = vmul.f32 0.01, %v1293_v21  ;;  %2337 = vmatmul.mubr.bf16.gmra.mrb[52].mxu1 %v1373_v16  ;;  %v1358_v26 = vmax.f32 %v1290_v57, %v1326_v20 }
 0x2eb   : > { %v1325_v25 = vmul.f32 0.01, %v1285_v23  ;;  %v1356_v28 = vmax.f32 %v1282_v17, %v1324_v56 }
 0x2ec   : > { %v1359_v27 = vmax.f32 %v1293_v21, %v1327_v24 }
 0x2ed   : > { %v1357_v29 = vmax.f32 %v1285_v23, %v1325_v25 }
 0x2ee   : > { %v1375_v30 = vpack.c.bf16 %v1359_v27, %v1358_v26 }
 0x2ef   : > { %v1374_v31 = vpack.c.bf16 %v1357_v29, %v1356_v28 }
 0x2f1   : > { %2340 = vmatprep.mubr.bf16.mxu1 %v1374_v31 }
 0x2f2   : > { %2341 = vmatmul.mubr.bf16.gmra.mrb[56].mxu1 %v1375_v30 }
 0x38d   : > { %v2314_v33 = vpop.f32.mrb[64].mxu0 }
 0x38e   : > { %v1481_v14 = vpop.f32.mrb[65].mxu0  ;;  %v1490_v36 = vadd.f32 %v2314_v33, %v2865_v34 }
 0x38f   : > { %v2315_v35 = vpop.f32.mrb[66].mxu0  ;;  %v1482_v39 = vadd.f32 %v2865_v34, %v1481_v14 }
 0x390   : > { %v1493_v37 = vadd.f32 %v2315_v35, %v2865_v34  ;;  %v1484_v38 = vpop.f32.mrb[67].mxu0 }
 0x391   : > { %v1485_v40 = vadd.f32 %v2865_v34, %v1484_v38 }
 0x392   : > { %v1990_v41 = vpack.c.bf16 %v1493_v37, %v1490_v36 }
 0x393   : > { %v1985_v42 = vpack.c.bf16 %v1485_v40, %v1482_v39 }
 0x394   : > { %2062 = vst [vmem:[%s2873_s26 + $0x8] sm:$0xff] %v1990_v41  }
 0x395   : > { %1986 = vst [vmem:[%s2873_s26] sm:$0xff] %v1985_v42   ;;  %v2318_v43 = vpop.f32.mrb[32].mxu1 }
 0x396   : > { %v1497_v44 = vpop.f32.mrb[33].mxu1  ;;  %v1506_v46 = vadd.f32 %v2318_v43, %v2865_v34 }
 0x397   : > { %v2319_v45 = vpop.f32.mrb[34].mxu1  ;;  %v1498_v49 = vadd.f32 %v2865_v34, %v1497_v44 }
 0x398   : > { %v1509_v47 = vadd.f32 %v2319_v45, %v2865_v34  ;;  %v1500_v48 = vpop.f32.mrb[35].mxu1 }
 0x399   : > { %v1501_v50 = vadd.f32 %v2865_v34, %v1500_v48 }
 0x39a   : > { %v2000_v51 = vpack.c.bf16 %v1509_v47, %v1506_v46 }
 0x39b   : > { %v1995_v32 = vpack.c.bf16 %v1501_v50, %v1498_v49 }
 0x39c   : > { %2064 = vst [vmem:[%s2873_s26 + $0x18] sm:$0xff] %v2000_v51  }
 0x39d   : > { %2063 = vst [vmem:[%s2873_s26 + $0x10] sm:$0xff] %v1995_v32   ;;  %v2322_v52 = vpop.f32.mrb[36].mxu1 }
 0x39e   : > { %v1513_v58 = vpop.f32.mrb[37].mxu1  ;;  %v1522_v59 = vadd.f32 %v2322_v52, %v2865_v34 }
 0x39f   : > { %v2323_v53 = vpop.f32.mrb[38].mxu1  ;;  %v1514_v62 = vadd.f32 %v2865_v34, %v1513_v58 }
 0x3a0   : > { %v1525_v60 = vadd.f32 %v2323_v53, %v2865_v34  ;;  %v1516_v61 = vpop.f32.mrb[39].mxu1 }
 0x3a1   : > { %v1517_v63 = vadd.f32 %v2865_v34, %v1516_v61 }
 0x3a2   : > { %v2010_v0 = vpack.c.bf16 %v1525_v60, %v1522_v59 }
 0x3a3   : > { %v2005_v1 = vpack.c.bf16 %v1517_v63, %v1514_v62 }
 0x3a4   : > { %2066 = vst [vmem:[%s2873_s26 + $0x28] sm:$0xff] %v2010_v0  }
 0x3a5   : > { %2065 = vst [vmem:[%s2873_s26 + $0x20] sm:$0xff] %v2005_v1   ;;  %v2326_v54 = vpop.f32.mrb[40].mxu1 }
 0x3a6   : > { %v1529_v2 = vpop.f32.mrb[41].mxu1  ;;  %v1538_v4 = vadd.f32 %v2326_v54, %v2865_v34 }
 0x3a7   : > { %v2327_v3 = vpop.f32.mrb[42].mxu1  ;;  %v1530_v7 = vadd.f32 %v2865_v34, %v1529_v2 }
 0x3a8   : > { %v1541_v5 = vadd.f32 %v2327_v3, %v2865_v34  ;;  %v1532_v6 = vpop.f32.mrb[43].mxu1 }
 0x3a9   : > { %v1533_v8 = vadd.f32 %v2865_v34, %v1532_v6 }
 0x3aa   : > { %v2020_v9 = vpack.c.bf16 %v1541_v5, %v1538_v4 }
 0x3ab   : > { %v2015_v10 = vpack.c.bf16 %v1533_v8, %v1530_v7 }
 0x3ac   : > { %2068 = vst [vmem:[%s2873_s26 + $0x38] sm:$0xff] %v2020_v9  }
 0x3ad   : > { %2067 = vst [vmem:[%s2873_s26 + $0x30] sm:$0xff] %v2015_v10   ;;  %v2330_v55 = vpop.f32.mrb[44].mxu1 }
 0x3ae   : > { %v1545_v11 = vpop.f32.mrb[45].mxu1  ;;  %v1554_v13 = vadd.f32 %v2330_v55, %v2865_v34 }
 0x3af   : > { %v2331_v12 = vpop.f32.mrb[46].mxu1  ;;  %v1546_v16 = vadd.f32 %v2865_v34, %v1545_v11 }
 0x3b0   : > { %v1557_v57 = vadd.f32 %v2331_v12, %v2865_v34  ;;  %v1548_v15 = vpop.f32.mrb[47].mxu1 }
 0x3b1   : > { %v1549_v17 = vadd.f32 %v2865_v34, %v1548_v15 }
 0x3b2   : > { %v2030_v18 = vpack.c.bf16 %v1557_v57, %v1554_v13 }
 0x3b3   : > { %v2025_v19 = vpack.c.bf16 %v1549_v17, %v1546_v16 }
 0x3b4   : > { %2070 = vst [vmem:[%s2873_s26 + $0x48] sm:$0xff] %v2030_v18  }
 0x3b5   : > { %2069 = vst [vmem:[%s2873_s26 + $0x40] sm:$0xff] %v2025_v19   ;;  %v2334_v20 = vpop.f32.mrb[48].mxu1 }
 0x3b6   : > { %v1561_v21 = vpop.f32.mrb[49].mxu1  ;;  %v1570_v56 = vadd.f32 %v2334_v20, %v2865_v34 }
 0x3b7   : > { %v2335_v22 = vpop.f32.mrb[50].mxu1  ;;  %v1562_v25 = vadd.f32 %v2865_v34, %v1561_v21 }
 0x3b8   : > { %v1573_v23 = vadd.f32 %v2335_v22, %v2865_v34  ;;  %v1564_v24 = vpop.f32.mrb[51].mxu1 }
 0x3b9   : > { %v1565_v26 = vadd.f32 %v2865_v34, %v1564_v24 }
 0x3ba   : > { %v2040_v27 = vpack.c.bf16 %v1573_v23, %v1570_v56 }
 0x3bb   : > { %v2035_v28 = vpack.c.bf16 %v1565_v26, %v1562_v25 }
 0x3bc   : > { %2072 = vst [vmem:[%s2873_s26 + $0x58] sm:$0xff] %v2040_v27  }
 0x3bd   : > { %2071 = vst [vmem:[%s2873_s26 + $0x50] sm:$0xff] %v2035_v28   ;;  %v2338_v29 = vpop.f32.mrb[52].mxu1 }
 0x3be   : > { %v1577_v30 = vpop.f32.mrb[53].mxu1  ;;  %v1586_v33 = vadd.f32 %v2338_v29, %v2865_v34 }
 0x3bf   : > { %v2339_v31 = vpop.f32.mrb[54].mxu1  ;;  %v1578_v36 = vadd.f32 %v2865_v34, %v1577_v30 }
 0x3c0   : > { %v1589_v14 = vadd.f32 %v2339_v31, %v2865_v34  ;;  %v1580_v35 = vpop.f32.mrb[55].mxu1 }
 0x3c1   : > { %v1581_v37 = vadd.f32 %v2865_v34, %v1580_v35 }
 0x3c2   : > { %v2050_v38 = vpack.c.bf16 %v1589_v14, %v1586_v33 }
 0x3c3   : > { %v2045_v39 = vpack.c.bf16 %v1581_v37, %v1578_v36 }
 0x3c4   : > { %2074 = vst [vmem:[%s2873_s26 + $0x68] sm:$0xff] %v2050_v38  }
 0x3c5   : > { %2073 = vst [vmem:[%s2873_s26 + $0x60] sm:$0xff] %v2045_v39   ;;  %v2342_v40 = vpop.f32.mrb[56].mxu1 }
 0x3c6   : > { %v1593_v41 = vpop.f32.mrb[57].mxu1  ;;  %v1602_v43 = vadd.f32 %v2342_v40, %v2865_v34 }
 0x3c7   : > { %v2343_v42 = vpop.f32.mrb[58].mxu1  ;;  %v1594_v46 = vadd.f32 %v2865_v34, %v1593_v41 }
 0x3c8   : > { %v1605_v44 = vadd.f32 %v2343_v42, %v2865_v34  ;;  %v1596_v45 = vpop.f32.mrb[59].mxu1 }
 0x3c9   : > { %v1597_v47 = vadd.f32 %v2865_v34, %v1596_v45 }
 0x3ca   : > { %v2060_v48 = vpack.c.bf16 %v1605_v44, %v1602_v43 }
 0x3cb   : > { %v2055_v49 = vpack.c.bf16 %v1597_v47, %v1594_v46 }
 0x3cc   : > { %2076 = vst [vmem:[%s2873_s26 + $0x78] sm:$0xff] %v2060_v48  }
 0x3cd   : > { %2075 = vst [vmem:[%s2873_s26 + $0x70] sm:$0xff] %v2055_v49  }
 0x3ce   : > { %2455 = shalt.err (!%p2452_p3)
}
 0x3cf   : > { %s2456_s22 = scalar_lea.hbm %s2922_s17, 2048  ;;  %s2460_s27 = scalar_lea.hbm %s2980_s9, 4096 }
 0x3d0   : > { %p2457_p4 = scmp.ne.s32.totalorder %s2922_s17, %s2456_s22  ;;  %p2461_p9 = scmp.lt.u32.totalorder %s2922_s17, %s2980_s9 }
 0x3d1   : > { %p2462_p10 = scmp.lt.u32.totalorder %s2460_s27, %s2456_s22  ;;  %p2464_p12 = scmp.lt.u32.totalorder %s2456_s22, %s2922_s17 }
 0x3d2   : > { %p2458_p7 = pnand %p2457_p4, %p2597_p5 }
 0x3d3   : > { %p2463_p11 = por %p2462_p10, %p2461_p9 }
 0x3d4   : > { %p2459_p8 = pneg %p2458_p7 }
 0x3d5   : > { %p2465_p13 = por %p2464_p12, %p2463_p11 }
 0x3d7   : > { %p2466_p0 = pnand %p2465_p13, %p2459_p8 }
 0x3d9   : > { %2469 = shalt.err (!%p2466_p0)
}
 0x3da   : > { %s2507_s16 = smov 64   ;;  %s2508_s21 = smov 4  }
 0x3db   : > { %2360 = dma.vmem_to_hbm [thread:$0]  (%p2597_p5), %s2924_s28, 2048, %s2922_s17, %s2930_s13, %s2507_s16, %s2507_s16, %s2508_s21  }
 0x3dc PF: > { %p2366_p1 = scmp.ge.s32.totalorder %s2504_s12, 2  ;;  %s1797_s23 = sand.u32 1, %s2492_s30  }
 0x3dd   : > { %s1798_s24 = scalar_lea.sflag [#allocation3], %s1797_s23 }
 0x3de   : > { %p2363_p2 = pnand %p2366_p1, %p2601_p6 }
 0x3e0   : > { %2487 = dma.done.wait (!%p2363_p2), %s1798_s24, 2048  }
 0x3e1   : > { %2489 = vsyncadd (!%p2363_p2), %s1798_s24, 4294965248  ;;  %p19_p3 = scmp.ge.s32.totalorder %s2584_s15, 4   ;;  %s2983_s30 = smov %s2496_s10 }
 0x3e2   : > { %s2984_s10 = smov %s2500_s11  ;;  %s2985_s11 = smov %s2595_s18 }
 0x3e3   : > { %s2986_s12 = smov %s2584_s15  ;;  %21 = sbr.rel (!%p19_p3) target bundleno = 3 (0x3), region = 91 }
 0x3ea   :  { %1803 = vsyncpa [#allocation3], 1 }
 0x3eb   :  { %1805 = vsyncpa [#allocation3 + $0x1], 1 }

</bundles_post_ra>
